<compile_context>
chip_gen: v5e
topology: v5e:2x2
jax: 0.10.0
libtpu: 0.0.40
codegen_flags: <defaults>
</compile_context>

<pallas_src>
import functools
import math

import jax
import jax.numpy as jnp
from jax import lax
from jax.experimental import pallas as pl
from jax.experimental.pallas import tpu as pltpu

CHECK_EVERY = 8      # Sinkhorn iterations between convergence checks
THRESH = 0.1         # PyTorch module's fixed stopping threshold
MXU_SUM_MIN = 128    # use MXU (dot-with-ones) sums when reduced dim >= this


def _sinkhorn_item_kernel(rows_ref, colsT_ref, cost_ref, *, eps, max_iter,
                          thresh, check_every, u_on_rows, log_mu, log_nu,
                          use_bf16_exp):
    # rows_ref: (1, Pr, D), colsT_ref: (1, D, Pc), cost_ref: (1, 1, 1), f32.
    # The in-kernel matrix is (Pr, Pc).  If u_on_rows, rows are the x points
    # (matrix = C); otherwise rows are the y points (matrix = C^T) so that
    # max(P1, P2) sits on the lane axis.
    r = rows_ref[0]                     # (Pr, D)
    cT = colsT_ref[0]                   # (D, Pc)
    Pr, D = r.shape
    Pc = cT.shape[1]

    # ---- cost matrix, built once ----
    if D <= 16:
        # Tiny contraction dim: build on the VPU, lane-dense, unrolled over D.
        C = None
        for d in range(D):
            diff = r[:, d:d + 1] - cT[d:d + 1, :]          # (Pr, Pc)
            term = diff * diff
            C = term if C is None else C + term
    else:
        # Large D: MXU-friendly ||r||^2 + ||c||^2 - 2 r.c expansion.
        r_sq = jnp.sum(r * r, axis=-1, keepdims=True)                 # (Pr, 1)
        c_sq = jnp.sum(cT * cT, axis=0, keepdims=True)                # (1, Pc)
        rc = lax.dot_general(r, cT, (((1,), (0,)), ((), ())),
                             preferred_element_type=jnp.float32)      # (Pr, Pc)
        C = r_sq + c_sq - 2.0 * rc

    # Loop-invariant scaled cost; only needed again for the final OT cost.
    nC = C * jnp.float32(-1.0 / eps)                                  # (Pr, Pc)

    sum_lanes_mxu = Pc >= MXU_SUM_MIN
    sum_sublanes_mxu = Pr >= MXU_SUM_MIN
    if sum_lanes_mxu:
        ones_cols = jnp.ones((Pc, 1), jnp.float32)
    if sum_sublanes_mxu:
        ones_rows = jnp.ones((1, Pr), jnp.float32)

    def _exp(z):
        if use_bf16_exp:
            # v6e/v7x only: bf16 EUP throughput ~2x f32; accumulate in f32.
            return jnp.exp(z.astype(jnp.bfloat16)).astype(jnp.float32)
        return jnp.exp(z)

    def lse_lanes(m):            # logsumexp over lanes  -> (Pr, 1)
        mx = jnp.max(m, axis=-1, keepdims=True)
        e = _exp(m - mx)
        if sum_lanes_mxu:
            s = lax.dot_general(e, ones_cols, (((1,), (0,)), ((), ())),
                                preferred_element_type=jnp.float32)
        else:
            s = jnp.sum(e, axis=-1, keepdims=True)
        return mx + jnp.log(s)

    def lse_sublanes(m):         # logsumexp over sublanes -> (1, Pc)
        mx = jnp.max(m, axis=0, keepdims=True)
        e = _exp(m - mx)
        if sum_sublanes_mxu:
            s = lax.dot_general(ones_rows, e, (((1,), (0,)), ((), ())),
                                preferred_element_type=jnp.float32)
        else:
            s = jnp.sum(e, axis=0, keepdims=True)
        return mx + jnp.log(s)

    # The u-update always reduces over the y-point axis of the matrix.
    if u_on_rows:
        lse_for_u, lse_for_v = lse_lanes, lse_sublanes
    else:
        lse_for_u, lse_for_v = lse_sublanes, lse_lanes

    def sinkhorn_step(M):
        # One full Sinkhorn iteration on the carried shifted matrix
        # M = -C/eps + u/eps + v/eps (same update order as the module).
        da = log_mu - lse_for_u(M)      # u/eps increment
        M = M + da
        db = log_nu - lse_for_v(M)      # v/eps increment
        M = M + db
        return M, da

    def run_block(M, nsteps):
        da = None
        for _ in range(nsteps):         # unrolled: straight-line for the LLO
            M, da = sinkhorn_step(M)
        # err in the module's unscaled-u units for the LAST step of the block.
        err = (eps * jnp.sum(jnp.abs(da))
               if da is not None else jnp.float32(jnp.inf))
        return M, err

    n_full = max_iter // check_every
    rem = max_iter % check_every

    def cond(carry):
        i, _, err = carry
        return jnp.logical_and(i < n_full, err >= thresh)

    def body(carry):
        i, M, _ = carry
        M, err = run_block(M, check_every)
        return i + jnp.int32(1), M, err

    init = (jnp.int32(0), nC, jnp.float32(jnp.inf))   # M(a=0, b=0) = nC
    _, M, err = lax.while_loop(cond, body, init)

    if rem > 0:
        # Remaining iterations so the total never exceeds max_iter.
        def _run_rem(m):
            m2, _ = run_block(m, rem)
            return m2
        M = lax.cond(err >= thresh, _run_rem, lambda m: m, M)

    # Transport plan & cost: pi = exp(M),  cost = sum(pi*C) = -eps*sum(pi*nC).
    pi = jnp.exp(M)                                                # (Pr, Pc)
    per_row = jnp.sum(pi * nC, axis=-1, keepdims=True)             # (Pr, 1)
    total = (-eps) * jnp.sum(per_row, axis=0, keepdims=True)       # (1, 1)
    cost_ref[...] = total.reshape(1, 1, 1)


def _round_up(v, m):
    return (v + m - 1) // m * m


def _vmem_capacity_bytes():
    try:
        cap = getattr(pltpu.get_tpu_info(), "vmem_capacity_bytes", None)
        if cap:
            return int(cap)
    except Exception:
        pass
    return 64 << 20   # conservative fallback (v7x per-core VMEM)


def _vmem_limit_bytes(Pr, Pc, D):
    # Per-grid-step working set: nC + carried M + a few same-sized exp/pi
    # temporaries, plus double-buffered point blocks.
    p_r = _round_up(max(Pr, 8), 8)
    p_c = _round_up(max(Pc, 128), 128)
    mat = p_r * p_c * 4
    pts = (p_r * _round_up(max(D, 128), 128)
           + _round_up(max(D, 8), 8) * p_c) * 4
    need = 6 * mat + 2 * pts + (1 << 20)
    cap = int(_vmem_capacity_bytes() * 0.85)      # ~54 MiB v7x, ~109 MiB v5e/v6e
    if need > cap:
        # TODO(synk): fall back to a lane-block-tiled (streamed) logsumexp
        # instead of raising, so very large point clouds still run.
        raise ValueError(
            f"SinkhornDistance per-item working set (~{need >> 20} MiB) "
            f"exceeds the per-core VMEM budget (~{cap >> 20} MiB) on this "
            "TPU generation; a P2-tiled logsumexp path is required.")
    return int(min(max(need, 8 << 20), cap))


def sinkhorn_distance(x, y, eps, max_iter, reduction="none", thresh=THRESH,
                      check_every=CHECK_EVERY, use_bf16_exp=False):
    x = jnp.asarray(x, jnp.float32)
    y = jnp.asarray(y, jnp.float32)
    squeeze = x.ndim == 2
    if squeeze:
        x = x[None]
        y = y[None]
    N, P1, D = x.shape
    P2 = y.shape[1]
    check_every = max(1, int(check_every))

    # Lane-aware orientation: put max(P1, P2) on the lane (last) axis of the
    # in-kernel matrix.  When P1 > P2 the matrix is stored as C^T (rows = y
    # points, cols = x points); the math is identical, only the layout flips.
    u_on_rows = P2 >= P1
    if u_on_rows:
        rows, colsT, Pr, Pc = x, jnp.swapaxes(y, 1, 2), P1, P2
    else:
        rows, colsT, Pr, Pc = y, jnp.swapaxes(x, 1, 2), P2, P1

    log_mu = math.log(1.0 / P1 + 1e-8)   # mu uniform over x points
    log_nu = math.log(1.0 / P2 + 1e-8)   # nu uniform over y points

    kernel = functools.partial(
        _sinkhorn_item_kernel, eps=float(eps), max_iter=int(max_iter),
        thresh=float(thresh), check_every=check_every, u_on_rows=u_on_rows,
        log_mu=log_mu, log_nu=log_nu, use_bf16_exp=bool(use_bf16_exp))

    out = pl.pallas_call(
        kernel,
        out_shape=jax.ShapeDtypeStruct((N, 1, 1), jnp.float32),
        grid_spec=pltpu.PrefetchScalarGridSpec(
            num_scalar_prefetch=0,
            grid=(N,),
            in_specs=[pl.BlockSpec((1, Pr, D), lambda i: (i, 0, 0)),
                      pl.BlockSpec((1, D, Pc), lambda i: (i, 0, 0))],
            out_specs=pl.BlockSpec((1, 1, 1), lambda i: (i, 0, 0))),
        compiler_params=pltpu.CompilerParams(
            dimension_semantics=("parallel",),
            vmem_limit_bytes=_vmem_limit_bytes(Pr, Pc, D)),
    )(rows, colsT)

    cost = out[:, 0, 0]
    if squeeze:
        cost = cost[0]
    if reduction == "mean":
        cost = cost.mean()
    elif reduction == "sum":
        cost = cost.sum()
    return cost


def _sinkhorn_single_ref(x, y, eps, max_iter, thresh, check_every):
    """Pure-JAX reference for ONE point-cloud pair.  Per-iteration math is
    exactly the PyTorch module's forward; the stopping rule mirrors the
    kernel (per-item error, checked every `check_every` iterations, with a
    remainder block so at most max_iter iterations run)."""
    P1 = x.shape[0]
    P2 = y.shape[0]
    C = jnp.sum((x[:, None, :] - y[None, :, :]) ** 2, axis=-1)
    log_mu = math.log(1.0 / P1 + 1e-8)
    log_nu = math.log(1.0 / P2 + 1e-8)

    def M(u, v):
        return (-C + u[:, None] + v[None, :]) / eps

    def step(u, v):
        u = eps * (log_mu - jax.scipy.special.logsumexp(M(u, v), axis=-1)) + u
        v = eps * (log_nu - jax.scipy.special.logsumexp(M(u, v).T, axis=-1)) + v
        return u, v

    def run_block(u, v, nsteps):
        u1 = u
        for _ in range(nsteps):
            u1 = u
            u, v = step(u, v)
        err = jnp.sum(jnp.abs(u - u1))
        return u, v, err

    n_full = max_iter // check_every
    rem = max_iter % check_every

    def cond(c):
        i, _, _, err = c
        return jnp.logical_and(i < n_full, err >= thresh)

    def body(c):
        i, u, v, _ = c
        u, v, err = run_block(u, v, check_every)
        return i + jnp.int32(1), u, v, err

    init = (jnp.int32(0), jnp.zeros((P1,), jnp.float32),
            jnp.zeros((P2,), jnp.float32), jnp.float32(jnp.inf))
    _, u, v, err = lax.while_loop(cond, body, init)

    if rem > 0:
        def _run_rem(uv):
            uu, vv = uv
            uu, vv, _ = run_block(uu, vv, rem)
            return uu, vv
        u, v = lax.cond(err >= thresh, _run_rem, lambda uv: uv, (u, v))

    pi = jnp.exp(M(u, v))
    return jnp.sum(pi * C)


if __name__ == "__main__":
    key = jax.random.PRNGKey(0)
    kx, ky = jax.random.split(key)

    # SinkhornDistance has no learned parameters; eps / max_iter are config.
    eps, max_iter = 0.1, 100
    N, P1, P2, D = 2, 16, 8, 4
    x = jax.random.normal(kx, (N, P1, D), dtype=jnp.float32)
    y = jax.random.normal(ky, (N, P2, D), dtype=jnp.float32)

    cost = sinkhorn_distance(x, y, eps, max_iter, reduction="none")
    cost = jax.block_until_ready(cost)

    ref = jnp.stack([
        _sinkhorn_single_ref(x[i], y[i], eps, max_iter, THRESH, CHECK_EVERY)
        for i in range(N)])
    ref = jax.block_until_ready(ref)

    assert cost.shape == (N,)
    assert bool(jnp.all(jnp.isfinite(cost)))
    assert bool(jnp.allclose(cost, ref, rtol=2e-2, atol=2e-2)), (cost, ref)

    print("KERNEL_OK")
</pallas_src>

<mosaic_0001>
module attributes {stable_mosaic.version = 11 : i64} {
  func.func @_sinkhorn_item_kernel(%arg0: i32, %arg1: memref<1x8x4xf32, #tpu.memory_space<vmem>>, %arg2: memref<1x4x16xf32, #tpu.memory_space<vmem>>, %arg3: memref<1x1x1xf32, #tpu.memory_space<vmem>>) attributes {dimension_semantics = [#tpu.dimension_semantics<parallel>], iteration_bounds = array<i64: 2>, scalar_prefetch = 0 : i64, scratch_operands = 0 : i64, tpu.core_type = #tpu.core_type<tc>, window_params = [{transform_indices = @transform_0, window_bounds = array<i64: 1, 8, 4>}, {transform_indices = @transform_1, window_bounds = array<i64: 1, 4, 16>}, {transform_indices = @transform_2, window_bounds = array<i64: 1, 1, 1>}]} {
    %c0 = arith.constant 0 : index
    %c0_0 = arith.constant 0 : index
    %c0_1 = arith.constant 0 : index
    %0 = vector.load %arg1[%c0, %c0_0, %c0_1] : memref<1x8x4xf32, #tpu.memory_space<vmem>>, vector<1x8x4xf32>
    %1 = vector.shape_cast %0 : vector<1x8x4xf32> to vector<8x4xf32>
    %c0_2 = arith.constant 0 : index
    %c0_3 = arith.constant 0 : index
    %c0_4 = arith.constant 0 : index
    %2 = vector.load %arg2[%c0_2, %c0_3, %c0_4] : memref<1x4x16xf32, #tpu.memory_space<vmem>>, vector<1x4x16xf32>
    %3 = vector.shape_cast %2 : vector<1x4x16xf32> to vector<4x16xf32>
    %4 = vector.extract_strided_slice %1 {offsets = [0, 0], sizes = [8, 1], strides = [1, 1]} : vector<8x4xf32> to vector<8x1xf32>
    %5 = vector.extract_strided_slice %3 {offsets = [0, 0], sizes = [1, 16], strides = [1, 1]} : vector<4x16xf32> to vector<1x16xf32>
    %6 = vector.broadcast %4 : vector<8x1xf32> to vector<8x16xf32>
    %7 = vector.broadcast %5 : vector<1x16xf32> to vector<8x16xf32>
    %8 = arith.subf %6, %7 : vector<8x16xf32>
    %9 = arith.mulf %8, %8 : vector<8x16xf32>
    %10 = vector.extract_strided_slice %1 {offsets = [0, 1], sizes = [8, 1], strides = [1, 1]} : vector<8x4xf32> to vector<8x1xf32>
    %11 = vector.extract_strided_slice %3 {offsets = [1, 0], sizes = [1, 16], strides = [1, 1]} : vector<4x16xf32> to vector<1x16xf32>
    %12 = vector.broadcast %10 : vector<8x1xf32> to vector<8x16xf32>
    %13 = vector.broadcast %11 : vector<1x16xf32> to vector<8x16xf32>
    %14 = arith.subf %12, %13 : vector<8x16xf32>
    %15 = arith.mulf %14, %14 : vector<8x16xf32>
    %16 = arith.addf %9, %15 : vector<8x16xf32>
    %17 = vector.extract_strided_slice %1 {offsets = [0, 2], sizes = [8, 1], strides = [1, 1]} : vector<8x4xf32> to vector<8x1xf32>
    %18 = vector.extract_strided_slice %3 {offsets = [2, 0], sizes = [1, 16], strides = [1, 1]} : vector<4x16xf32> to vector<1x16xf32>
    %19 = vector.broadcast %17 : vector<8x1xf32> to vector<8x16xf32>
    %20 = vector.broadcast %18 : vector<1x16xf32> to vector<8x16xf32>
    %21 = arith.subf %19, %20 : vector<8x16xf32>
    %22 = arith.mulf %21, %21 : vector<8x16xf32>
    %23 = arith.addf %16, %22 : vector<8x16xf32>
    %24 = vector.extract_strided_slice %1 {offsets = [0, 3], sizes = [8, 1], strides = [1, 1]} : vector<8x4xf32> to vector<8x1xf32>
    %25 = vector.extract_strided_slice %3 {offsets = [3, 0], sizes = [1, 16], strides = [1, 1]} : vector<4x16xf32> to vector<1x16xf32>
    %26 = vector.broadcast %24 : vector<8x1xf32> to vector<8x16xf32>
    %27 = vector.broadcast %25 : vector<1x16xf32> to vector<8x16xf32>
    %28 = arith.subf %26, %27 : vector<8x16xf32>
    %29 = arith.mulf %28, %28 : vector<8x16xf32>
    %30 = arith.addf %23, %29 : vector<8x16xf32>
    %cst = arith.constant -1.000000e+01 : f32
    %31 = vector.broadcast %cst : f32 to vector<8x16xf32>
    %32 = arith.mulf %30, %31 : vector<8x16xf32>
    %c0_i32 = arith.constant 0 : i32
    %cst_5 = arith.constant 0x7F800000 : f32
    %33:3 = scf.while (%arg4 = %c0_i32, %arg5 = %32, %arg6 = %cst_5) : (i32, vector<8x16xf32>, f32) -> (i32, vector<8x16xf32>, f32) {
      %c12_i32 = arith.constant 12 : i32
      %48 = arith.cmpi slt, %arg4, %c12_i32 : i32
      %cst_14 = arith.constant 1.000000e-01 : f32
      %49 = arith.cmpf oge, %arg6, %cst_14 : f32
      %50 = arith.andi %48, %49 : i1
      scf.condition(%50) %arg4, %arg5, %arg6 : i32, vector<8x16xf32>, f32
    } do {
    ^bb0(%arg4: i32, %arg5: vector<8x16xf32>, %arg6: f32):
      %cst_14 = arith.constant dense<0xFF800000> : vector<16xf32>
      %48 = vector.multi_reduction <maximumf>, %arg5, %cst_14 [0] : vector<8x16xf32> to vector<16xf32>
      %49 = vector.shape_cast %48 : vector<16xf32> to vector<1x16xf32>
      %50 = vector.broadcast %49 : vector<1x16xf32> to vector<8x16xf32>
      %51 = arith.subf %arg5, %50 : vector<8x16xf32>
      %52 = math.exp %51 : vector<8x16xf32>
      %cst_15 = arith.constant dense<0.000000e+00> : vector<16xf32>
      %53 = vector.multi_reduction <add>, %52, %cst_15 [0] : vector<8x16xf32> to vector<16xf32>
      %54 = vector.shape_cast %53 : vector<16xf32> to vector<1x16xf32>
      %55 = math.log %54 : vector<1x16xf32>
      %56 = arith.addf %49, %55 : vector<1x16xf32>
      %cst_16 = arith.constant -2.77258849 : f32
      %57 = vector.broadcast %cst_16 : f32 to vector<1x16xf32>
      %58 = arith.subf %57, %56 : vector<1x16xf32>
      %59 = vector.broadcast %58 : vector<1x16xf32> to vector<8x16xf32>
      %60 = arith.addf %arg5, %59 : vector<8x16xf32>
      %cst_17 = arith.constant dense<0xFF800000> : vector<8xf32>
      %61 = vector.multi_reduction <maximumf>, %60, %cst_17 [1] : vector<8x16xf32> to vector<8xf32>
      %62 = vector.shape_cast %61 : vector<8xf32> to vector<8x1xf32>
      %63 = vector.broadcast %62 : vector<8x1xf32> to vector<8x16xf32>
      %64 = arith.subf %60, %63 : vector<8x16xf32>
      %65 = math.exp %64 : vector<8x16xf32>
      %cst_18 = arith.constant dense<0.000000e+00> : vector<8xf32>
      %66 = vector.multi_reduction <add>, %65, %cst_18 [1] : vector<8x16xf32> to vector<8xf32>
      %67 = vector.shape_cast %66 : vector<8xf32> to vector<8x1xf32>
      %68 = math.log %67 : vector<8x1xf32>
      %69 = arith.addf %62, %68 : vector<8x1xf32>
      %cst_19 = arith.constant -2.07944155 : f32
      %70 = vector.broadcast %cst_19 : f32 to vector<8x1xf32>
      %71 = arith.subf %70, %69 : vector<8x1xf32>
      %72 = vector.broadcast %71 : vector<8x1xf32> to vector<8x16xf32>
      %73 = arith.addf %60, %72 : vector<8x16xf32>
      %cst_20 = arith.constant dense<0xFF800000> : vector<16xf32>
      %74 = vector.multi_reduction <maximumf>, %73, %cst_20 [0] : vector<8x16xf32> to vector<16xf32>
      %75 = vector.shape_cast %74 : vector<16xf32> to vector<1x16xf32>
      %76 = vector.broadcast %75 : vector<1x16xf32> to vector<8x16xf32>
      %77 = arith.subf %73, %76 : vector<8x16xf32>
      %78 = math.exp %77 : vector<8x16xf32>
      %cst_21 = arith.constant dense<0.000000e+00> : vector<16xf32>
      %79 = vector.multi_reduction <add>, %78, %cst_21 [0] : vector<8x16xf32> to vector<16xf32>
      %80 = vector.shape_cast %79 : vector<16xf32> to vector<1x16xf32>
      %81 = math.log %80 : vector<1x16xf32>
      %82 = arith.addf %75, %81 : vector<1x16xf32>
      %cst_22 = arith.constant -2.77258849 : f32
      %83 = vector.broadcast %cst_22 : f32 to vector<1x16xf32>
      %84 = arith.subf %83, %82 : vector<1x16xf32>
      %85 = vector.broadcast %84 : vector<1x16xf32> to vector<8x16xf32>
      %86 = arith.addf %73, %85 : vector<8x16xf32>
      %cst_23 = arith.constant dense<0xFF800000> : vector<8xf32>
      %87 = vector.multi_reduction <maximumf>, %86, %cst_23 [1] : vector<8x16xf32> to vector<8xf32>
      %88 = vector.shape_cast %87 : vector<8xf32> to vector<8x1xf32>
      %89 = vector.broadcast %88 : vector<8x1xf32> to vector<8x16xf32>
      %90 = arith.subf %86, %89 : vector<8x16xf32>
      %91 = math.exp %90 : vector<8x16xf32>
      %cst_24 = arith.constant dense<0.000000e+00> : vector<8xf32>
      %92 = vector.multi_reduction <add>, %91, %cst_24 [1] : vector<8x16xf32> to vector<8xf32>
      %93 = vector.shape_cast %92 : vector<8xf32> to vector<8x1xf32>
      %94 = math.log %93 : vector<8x1xf32>
      %95 = arith.addf %88, %94 : vector<8x1xf32>
      %cst_25 = arith.constant -2.07944155 : f32
      %96 = vector.broadcast %cst_25 : f32 to vector<8x1xf32>
      %97 = arith.subf %96, %95 : vector<8x1xf32>
      %98 = vector.broadcast %97 : vector<8x1xf32> to vector<8x16xf32>
      %99 = arith.addf %86, %98 : vector<8x16xf32>
      %cst_26 = arith.constant dense<0xFF800000> : vector<16xf32>
      %100 = vector.multi_reduction <maximumf>, %99, %cst_26 [0] : vector<8x16xf32> to vector<16xf32>
      %101 = vector.shape_cast %100 : vector<16xf32> to vector<1x16xf32>
      %102 = vector.broadcast %101 : vector<1x16xf32> to vector<8x16xf32>
      %103 = arith.subf %99, %102 : vector<8x16xf32>
      %104 = math.exp %103 : vector<8x16xf32>
      %cst_27 = arith.constant dense<0.000000e+00> : vector<16xf32>
      %105 = vector.multi_reduction <add>, %104, %cst_27 [0] : vector<8x16xf32> to vector<16xf32>
      %106 = vector.shape_cast %105 : vector<16xf32> to vector<1x16xf32>
      %107 = math.log %106 : vector<1x16xf32>
      %108 = arith.addf %101, %107 : vector<1x16xf32>
      %cst_28 = arith.constant -2.77258849 : f32
      %109 = vector.broadcast %cst_28 : f32 to vector<1x16xf32>
      %110 = arith.subf %109, %108 : vector<1x16xf32>
      %111 = vector.broadcast %110 : vector<1x16xf32> to vector<8x16xf32>
      %112 = arith.addf %99, %111 : vector<8x16xf32>
      %cst_29 = arith.constant dense<0xFF800000> : vector<8xf32>
      %113 = vector.multi_reduction <maximumf>, %112, %cst_29 [1] : vector<8x16xf32> to vector<8xf32>
      %114 = vector.shape_cast %113 : vector<8xf32> to vector<8x1xf32>
      %115 = vector.broadcast %114 : vector<8x1xf32> to vector<8x16xf32>
      %116 = arith.subf %112, %115 : vector<8x16xf32>
      %117 = math.exp %116 : vector<8x16xf32>
      %cst_30 = arith.constant dense<0.000000e+00> : vector<8xf32>
      %118 = vector.multi_reduction <add>, %117, %cst_30 [1] : vector<8x16xf32> to vector<8xf32>
      %119 = vector.shape_cast %118 : vector<8xf32> to vector<8x1xf32>
      %120 = math.log %119 : vector<8x1xf32>
      %121 = arith.addf %114, %120 : vector<8x1xf32>
      %cst_31 = arith.constant -2.07944155 : f32
      %122 = vector.broadcast %cst_31 : f32 to vector<8x1xf32>
      %123 = arith.subf %122, %121 : vector<8x1xf32>
      %124 = vector.broadcast %123 : vector<8x1xf32> to vector<8x16xf32>
      %125 = arith.addf %112, %124 : vector<8x16xf32>
      %cst_32 = arith.constant dense<0xFF800000> : vector<16xf32>
      %126 = vector.multi_reduction <maximumf>, %125, %cst_32 [0] : vector<8x16xf32> to vector<16xf32>
      %127 = vector.shape_cast %126 : vector<16xf32> to vector<1x16xf32>
      %128 = vector.broadcast %127 : vector<1x16xf32> to vector<8x16xf32>
      %129 = arith.subf %125, %128 : vector<8x16xf32>
      %130 = math.exp %129 : vector<8x16xf32>
      %cst_33 = arith.constant dense<0.000000e+00> : vector<16xf32>
      %131 = vector.multi_reduction <add>, %130, %cst_33 [0] : vector<8x16xf32> to vector<16xf32>
      %132 = vector.shape_cast %131 : vector<16xf32> to vector<1x16xf32>
      %133 = math.log %132 : vector<1x16xf32>
      %134 = arith.addf %127, %133 : vector<1x16xf32>
      %cst_34 = arith.constant -2.77258849 : f32
      %135 = vector.broadcast %cst_34 : f32 to vector<1x16xf32>
      %136 = arith.subf %135, %134 : vector<1x16xf32>
      %137 = vector.broadcast %136 : vector<1x16xf32> to vector<8x16xf32>
      %138 = arith.addf %125, %137 : vector<8x16xf32>
      %cst_35 = arith.constant dense<0xFF800000> : vector<8xf32>
      %139 = vector.multi_reduction <maximumf>, %138, %cst_35 [1] : vector<8x16xf32> to vector<8xf32>
      %140 = vector.shape_cast %139 : vector<8xf32> to vector<8x1xf32>
      %141 = vector.broadcast %140 : vector<8x1xf32> to vector<8x16xf32>
      %142 = arith.subf %138, %141 : vector<8x16xf32>
      %143 = math.exp %142 : vector<8x16xf32>
      %cst_36 = arith.constant dense<0.000000e+00> : vector<8xf32>
      %144 = vector.multi_reduction <add>, %143, %cst_36 [1] : vector<8x16xf32> to vector<8xf32>
      %145 = vector.shape_cast %144 : vector<8xf32> to vector<8x1xf32>
      %146 = math.log %145 : vector<8x1xf32>
      %147 = arith.addf %140, %146 : vector<8x1xf32>
      %cst_37 = arith.constant -2.07944155 : f32
      %148 = vector.broadcast %cst_37 : f32 to vector<8x1xf32>
      %149 = arith.subf %148, %147 : vector<8x1xf32>
      %150 = vector.broadcast %149 : vector<8x1xf32> to vector<8x16xf32>
      %151 = arith.addf %138, %150 : vector<8x16xf32>
      %cst_38 = arith.constant dense<0xFF800000> : vector<16xf32>
      %152 = vector.multi_reduction <maximumf>, %151, %cst_38 [0] : vector<8x16xf32> to vector<16xf32>
      %153 = vector.shape_cast %152 : vector<16xf32> to vector<1x16xf32>
      %154 = vector.broadcast %153 : vector<1x16xf32> to vector<8x16xf32>
      %155 = arith.subf %151, %154 : vector<8x16xf32>
      %156 = math.exp %155 : vector<8x16xf32>
      %cst_39 = arith.constant dense<0.000000e+00> : vector<16xf32>
      %157 = vector.multi_reduction <add>, %156, %cst_39 [0] : vector<8x16xf32> to vector<16xf32>
      %158 = vector.shape_cast %157 : vector<16xf32> to vector<1x16xf32>
      %159 = math.log %158 : vector<1x16xf32>
      %160 = arith.addf %153, %159 : vector<1x16xf32>
      %cst_40 = arith.constant -2.77258849 : f32
      %161 = vector.broadcast %cst_40 : f32 to vector<1x16xf32>
      %162 = arith.subf %161, %160 : vector<1x16xf32>
      %163 = vector.broadcast %162 : vector<1x16xf32> to vector<8x16xf32>
      %164 = arith.addf %151, %163 : vector<8x16xf32>
      %cst_41 = arith.constant dense<0xFF800000> : vector<8xf32>
      %165 = vector.multi_reduction <maximumf>, %164, %cst_41 [1] : vector<8x16xf32> to vector<8xf32>
      %166 = vector.shape_cast %165 : vector<8xf32> to vector<8x1xf32>
      %167 = vector.broadcast %166 : vector<8x1xf32> to vector<8x16xf32>
      %168 = arith.subf %164, %167 : vector<8x16xf32>
      %169 = math.exp %168 : vector<8x16xf32>
      %cst_42 = arith.constant dense<0.000000e+00> : vector<8xf32>
      %170 = vector.multi_reduction <add>, %169, %cst_42 [1] : vector<8x16xf32> to vector<8xf32>
      %171 = vector.shape_cast %170 : vector<8xf32> to vector<8x1xf32>
      %172 = math.log %171 : vector<8x1xf32>
      %173 = arith.addf %166, %172 : vector<8x1xf32>
      %cst_43 = arith.constant -2.07944155 : f32
      %174 = vector.broadcast %cst_43 : f32 to vector<8x1xf32>
      %175 = arith.subf %174, %173 : vector<8x1xf32>
      %176 = vector.broadcast %175 : vector<8x1xf32> to vector<8x16xf32>
      %177 = arith.addf %164, %176 : vector<8x16xf32>
      %cst_44 = arith.constant dense<0xFF800000> : vector<16xf32>
      %178 = vector.multi_reduction <maximumf>, %177, %cst_44 [0] : vector<8x16xf32> to vector<16xf32>
      %179 = vector.shape_cast %178 : vector<16xf32> to vector<1x16xf32>
      %180 = vector.broadcast %179 : vector<1x16xf32> to vector<8x16xf32>
      %181 = arith.subf %177, %180 : vector<8x16xf32>
      %182 = math.exp %181 : vector<8x16xf32>
      %cst_45 = arith.constant dense<0.000000e+00> : vector<16xf32>
      %183 = vector.multi_reduction <add>, %182, %cst_45 [0] : vector<8x16xf32> to vector<16xf32>
      %184 = vector.shape_cast %183 : vector<16xf32> to vector<1x16xf32>
      %185 = math.log %184 : vector<1x16xf32>
      %186 = arith.addf %179, %185 : vector<1x16xf32>
      %cst_46 = arith.constant -2.77258849 : f32
      %187 = vector.broadcast %cst_46 : f32 to vector<1x16xf32>
      %188 = arith.subf %187, %186 : vector<1x16xf32>
      %189 = vector.broadcast %188 : vector<1x16xf32> to vector<8x16xf32>
      %190 = arith.addf %177, %189 : vector<8x16xf32>
      %cst_47 = arith.constant dense<0xFF800000> : vector<8xf32>
      %191 = vector.multi_reduction <maximumf>, %190, %cst_47 [1] : vector<8x16xf32> to vector<8xf32>
      %192 = vector.shape_cast %191 : vector<8xf32> to vector<8x1xf32>
      %193 = vector.broadcast %192 : vector<8x1xf32> to vector<8x16xf32>
      %194 = arith.subf %190, %193 : vector<8x16xf32>
      %195 = math.exp %194 : vector<8x16xf32>
      %cst_48 = arith.constant dense<0.000000e+00> : vector<8xf32>
      %196 = vector.multi_reduction <add>, %195, %cst_48 [1] : vector<8x16xf32> to vector<8xf32>
      %197 = vector.shape_cast %196 : vector<8xf32> to vector<8x1xf32>
      %198 = math.log %197 : vector<8x1xf32>
      %199 = arith.addf %192, %198 : vector<8x1xf32>
      %cst_49 = arith.constant -2.07944155 : f32
      %200 = vector.broadcast %cst_49 : f32 to vector<8x1xf32>
      %201 = arith.subf %200, %199 : vector<8x1xf32>
      %202 = vector.broadcast %201 : vector<8x1xf32> to vector<8x16xf32>
      %203 = arith.addf %190, %202 : vector<8x16xf32>
      %cst_50 = arith.constant dense<0xFF800000> : vector<16xf32>
      %204 = vector.multi_reduction <maximumf>, %203, %cst_50 [0] : vector<8x16xf32> to vector<16xf32>
      %205 = vector.shape_cast %204 : vector<16xf32> to vector<1x16xf32>
      %206 = vector.broadcast %205 : vector<1x16xf32> to vector<8x16xf32>
      %207 = arith.subf %203, %206 : vector<8x16xf32>
      %208 = math.exp %207 : vector<8x16xf32>
      %cst_51 = arith.constant dense<0.000000e+00> : vector<16xf32>
      %209 = vector.multi_reduction <add>, %208, %cst_51 [0] : vector<8x16xf32> to vector<16xf32>
      %210 = vector.shape_cast %209 : vector<16xf32> to vector<1x16xf32>
      %211 = math.log %210 : vector<1x16xf32>
      %212 = arith.addf %205, %211 : vector<1x16xf32>
      %cst_52 = arith.constant -2.77258849 : f32
      %213 = vector.broadcast %cst_52 : f32 to vector<1x16xf32>
      %214 = arith.subf %213, %212 : vector<1x16xf32>
      %215 = vector.broadcast %214 : vector<1x16xf32> to vector<8x16xf32>
      %216 = arith.addf %203, %215 : vector<8x16xf32>
      %cst_53 = arith.constant dense<0xFF800000> : vector<8xf32>
      %217 = vector.multi_reduction <maximumf>, %216, %cst_53 [1] : vector<8x16xf32> to vector<8xf32>
      %218 = vector.shape_cast %217 : vector<8xf32> to vector<8x1xf32>
      %219 = vector.broadcast %218 : vector<8x1xf32> to vector<8x16xf32>
      %220 = arith.subf %216, %219 : vector<8x16xf32>
      %221 = math.exp %220 : vector<8x16xf32>
      %cst_54 = arith.constant dense<0.000000e+00> : vector<8xf32>
      %222 = vector.multi_reduction <add>, %221, %cst_54 [1] : vector<8x16xf32> to vector<8xf32>
      %223 = vector.shape_cast %222 : vector<8xf32> to vector<8x1xf32>
      %224 = math.log %223 : vector<8x1xf32>
      %225 = arith.addf %218, %224 : vector<8x1xf32>
      %cst_55 = arith.constant -2.07944155 : f32
      %226 = vector.broadcast %cst_55 : f32 to vector<8x1xf32>
      %227 = arith.subf %226, %225 : vector<8x1xf32>
      %228 = vector.broadcast %227 : vector<8x1xf32> to vector<8x16xf32>
      %229 = arith.addf %216, %228 : vector<8x16xf32>
      %cst_56 = arith.constant dense<0xFF800000> : vector<16xf32>
      %230 = vector.multi_reduction <maximumf>, %229, %cst_56 [0] : vector<8x16xf32> to vector<16xf32>
      %231 = vector.shape_cast %230 : vector<16xf32> to vector<1x16xf32>
      %232 = vector.broadcast %231 : vector<1x16xf32> to vector<8x16xf32>
      %233 = arith.subf %229, %232 : vector<8x16xf32>
      %234 = math.exp %233 : vector<8x16xf32>
      %cst_57 = arith.constant dense<0.000000e+00> : vector<16xf32>
      %235 = vector.multi_reduction <add>, %234, %cst_57 [0] : vector<8x16xf32> to vector<16xf32>
      %236 = vector.shape_cast %235 : vector<16xf32> to vector<1x16xf32>
      %237 = math.log %236 : vector<1x16xf32>
      %238 = arith.addf %231, %237 : vector<1x16xf32>
      %cst_58 = arith.constant -2.77258849 : f32
      %239 = vector.broadcast %cst_58 : f32 to vector<1x16xf32>
      %240 = arith.subf %239, %238 : vector<1x16xf32>
      %241 = vector.broadcast %240 : vector<1x16xf32> to vector<8x16xf32>
      %242 = arith.addf %229, %241 : vector<8x16xf32>
      %cst_59 = arith.constant dense<0xFF800000> : vector<8xf32>
      %243 = vector.multi_reduction <maximumf>, %242, %cst_59 [1] : vector<8x16xf32> to vector<8xf32>
      %244 = vector.shape_cast %243 : vector<8xf32> to vector<8x1xf32>
      %245 = vector.broadcast %244 : vector<8x1xf32> to vector<8x16xf32>
      %246 = arith.subf %242, %245 : vector<8x16xf32>
      %247 = math.exp %246 : vector<8x16xf32>
      %cst_60 = arith.constant dense<0.000000e+00> : vector<8xf32>
      %248 = vector.multi_reduction <add>, %247, %cst_60 [1] : vector<8x16xf32> to vector<8xf32>
      %249 = vector.shape_cast %248 : vector<8xf32> to vector<8x1xf32>
      %250 = math.log %249 : vector<8x1xf32>
      %251 = arith.addf %244, %250 : vector<8x1xf32>
      %cst_61 = arith.constant -2.07944155 : f32
      %252 = vector.broadcast %cst_61 : f32 to vector<8x1xf32>
      %253 = arith.subf %252, %251 : vector<8x1xf32>
      %254 = vector.broadcast %253 : vector<8x1xf32> to vector<8x16xf32>
      %255 = arith.addf %242, %254 : vector<8x16xf32>
      %256 = math.absf %240 : vector<1x16xf32>
      %257 = vector.shape_cast %256 : vector<1x16xf32> to vector<1x1x16xf32>
      %cst_62 = arith.constant dense<0.000000e+00> : vector<1xf32>
      %258 = vector.multi_reduction <add>, %257, %cst_62 [1, 2] : vector<1x1x16xf32> to vector<1xf32>
      %259 = vector.shape_cast %258 : vector<1xf32> to vector<1x1x1xf32>
      %260 = vector.extract %259[0, 0, 0] : f32 from vector<1x1x1xf32>
      %cst_63 = arith.constant 1.000000e-01 : f32
      %261 = arith.mulf %cst_63, %260 : f32
      %c1_i32 = arith.constant 1 : i32
      %262 = arith.addi %arg4, %c1_i32 : i32
      scf.yield %262, %255, %261 : i32, vector<8x16xf32>, f32
    }
    %cst_6 = arith.constant 1.000000e-01 : f32
    %34 = arith.cmpf oge, %33#2, %cst_6 : f32
    %35 = arith.extui %34 : i1 to i32
    %c0_i32_7 = arith.constant 0 : i32
    %36 = arith.cmpi ne, %35, %c0_i32_7 : i32
    %37 = scf.if %36 -> (vector<8x16xf32>) {
      %cst_14 = arith.constant dense<0xFF800000> : vector<16xf32>
      %48 = vector.multi_reduction <maximumf>, %33#1, %cst_14 [0] : vector<8x16xf32> to vector<16xf32>
      %49 = vector.shape_cast %48 : vector<16xf32> to vector<1x16xf32>
      %50 = vector.broadcast %49 : vector<1x16xf32> to vector<8x16xf32>
      %51 = arith.subf %33#1, %50 : vector<8x16xf32>
      %52 = math.exp %51 : vector<8x16xf32>
      %cst_15 = arith.constant dense<0.000000e+00> : vector<16xf32>
      %53 = vector.multi_reduction <add>, %52, %cst_15 [0] : vector<8x16xf32> to vector<16xf32>
      %54 = vector.shape_cast %53 : vector<16xf32> to vector<1x16xf32>
      %55 = math.log %54 : vector<1x16xf32>
      %56 = arith.addf %49, %55 : vector<1x16xf32>
      %cst_16 = arith.constant -2.77258849 : f32
      %57 = vector.broadcast %cst_16 : f32 to vector<1x16xf32>
      %58 = arith.subf %57, %56 : vector<1x16xf32>
      %59 = vector.broadcast %58 : vector<1x16xf32> to vector<8x16xf32>
      %60 = arith.addf %33#1, %59 : vector<8x16xf32>
      %cst_17 = arith.constant dense<0xFF800000> : vector<8xf32>
      %61 = vector.multi_reduction <maximumf>, %60, %cst_17 [1] : vector<8x16xf32> to vector<8xf32>
      %62 = vector.shape_cast %61 : vector<8xf32> to vector<8x1xf32>
      %63 = vector.broadcast %62 : vector<8x1xf32> to vector<8x16xf32>
      %64 = arith.subf %60, %63 : vector<8x16xf32>
      %65 = math.exp %64 : vector<8x16xf32>
      %cst_18 = arith.constant dense<0.000000e+00> : vector<8xf32>
      %66 = vector.multi_reduction <add>, %65, %cst_18 [1] : vector<8x16xf32> to vector<8xf32>
      %67 = vector.shape_cast %66 : vector<8xf32> to vector<8x1xf32>
      %68 = math.log %67 : vector<8x1xf32>
      %69 = arith.addf %62, %68 : vector<8x1xf32>
      %cst_19 = arith.constant -2.07944155 : f32
      %70 = vector.broadcast %cst_19 : f32 to vector<8x1xf32>
      %71 = arith.subf %70, %69 : vector<8x1xf32>
      %72 = vector.broadcast %71 : vector<8x1xf32> to vector<8x16xf32>
      %73 = arith.addf %60, %72 : vector<8x16xf32>
      %cst_20 = arith.constant dense<0xFF800000> : vector<16xf32>
      %74 = vector.multi_reduction <maximumf>, %73, %cst_20 [0] : vector<8x16xf32> to vector<16xf32>
      %75 = vector.shape_cast %74 : vector<16xf32> to vector<1x16xf32>
      %76 = vector.broadcast %75 : vector<1x16xf32> to vector<8x16xf32>
      %77 = arith.subf %73, %76 : vector<8x16xf32>
      %78 = math.exp %77 : vector<8x16xf32>
      %cst_21 = arith.constant dense<0.000000e+00> : vector<16xf32>
      %79 = vector.multi_reduction <add>, %78, %cst_21 [0] : vector<8x16xf32> to vector<16xf32>
      %80 = vector.shape_cast %79 : vector<16xf32> to vector<1x16xf32>
      %81 = math.log %80 : vector<1x16xf32>
      %82 = arith.addf %75, %81 : vector<1x16xf32>
      %cst_22 = arith.constant -2.77258849 : f32
      %83 = vector.broadcast %cst_22 : f32 to vector<1x16xf32>
      %84 = arith.subf %83, %82 : vector<1x16xf32>
      %85 = vector.broadcast %84 : vector<1x16xf32> to vector<8x16xf32>
      %86 = arith.addf %73, %85 : vector<8x16xf32>
      %cst_23 = arith.constant dense<0xFF800000> : vector<8xf32>
      %87 = vector.multi_reduction <maximumf>, %86, %cst_23 [1] : vector<8x16xf32> to vector<8xf32>
      %88 = vector.shape_cast %87 : vector<8xf32> to vector<8x1xf32>
      %89 = vector.broadcast %88 : vector<8x1xf32> to vector<8x16xf32>
      %90 = arith.subf %86, %89 : vector<8x16xf32>
      %91 = math.exp %90 : vector<8x16xf32>
      %cst_24 = arith.constant dense<0.000000e+00> : vector<8xf32>
      %92 = vector.multi_reduction <add>, %91, %cst_24 [1] : vector<8x16xf32> to vector<8xf32>
      %93 = vector.shape_cast %92 : vector<8xf32> to vector<8x1xf32>
      %94 = math.log %93 : vector<8x1xf32>
      %95 = arith.addf %88, %94 : vector<8x1xf32>
      %cst_25 = arith.constant -2.07944155 : f32
      %96 = vector.broadcast %cst_25 : f32 to vector<8x1xf32>
      %97 = arith.subf %96, %95 : vector<8x1xf32>
      %98 = vector.broadcast %97 : vector<8x1xf32> to vector<8x16xf32>
      %99 = arith.addf %86, %98 : vector<8x16xf32>
      %cst_26 = arith.constant dense<0xFF800000> : vector<16xf32>
      %100 = vector.multi_reduction <maximumf>, %99, %cst_26 [0] : vector<8x16xf32> to vector<16xf32>
      %101 = vector.shape_cast %100 : vector<16xf32> to vector<1x16xf32>
      %102 = vector.broadcast %101 : vector<1x16xf32> to vector<8x16xf32>
      %103 = arith.subf %99, %102 : vector<8x16xf32>
      %104 = math.exp %103 : vector<8x16xf32>
      %cst_27 = arith.constant dense<0.000000e+00> : vector<16xf32>
      %105 = vector.multi_reduction <add>, %104, %cst_27 [0] : vector<8x16xf32> to vector<16xf32>
      %106 = vector.shape_cast %105 : vector<16xf32> to vector<1x16xf32>
      %107 = math.log %106 : vector<1x16xf32>
      %108 = arith.addf %101, %107 : vector<1x16xf32>
      %cst_28 = arith.constant -2.77258849 : f32
      %109 = vector.broadcast %cst_28 : f32 to vector<1x16xf32>
      %110 = arith.subf %109, %108 : vector<1x16xf32>
      %111 = vector.broadcast %110 : vector<1x16xf32> to vector<8x16xf32>
      %112 = arith.addf %99, %111 : vector<8x16xf32>
      %cst_29 = arith.constant dense<0xFF800000> : vector<8xf32>
      %113 = vector.multi_reduction <maximumf>, %112, %cst_29 [1] : vector<8x16xf32> to vector<8xf32>
      %114 = vector.shape_cast %113 : vector<8xf32> to vector<8x1xf32>
      %115 = vector.broadcast %114 : vector<8x1xf32> to vector<8x16xf32>
      %116 = arith.subf %112, %115 : vector<8x16xf32>
      %117 = math.exp %116 : vector<8x16xf32>
      %cst_30 = arith.constant dense<0.000000e+00> : vector<8xf32>
      %118 = vector.multi_reduction <add>, %117, %cst_30 [1] : vector<8x16xf32> to vector<8xf32>
      %119 = vector.shape_cast %118 : vector<8xf32> to vector<8x1xf32>
      %120 = math.log %119 : vector<8x1xf32>
      %121 = arith.addf %114, %120 : vector<8x1xf32>
      %cst_31 = arith.constant -2.07944155 : f32
      %122 = vector.broadcast %cst_31 : f32 to vector<8x1xf32>
      %123 = arith.subf %122, %121 : vector<8x1xf32>
      %124 = vector.broadcast %123 : vector<8x1xf32> to vector<8x16xf32>
      %125 = arith.addf %112, %124 : vector<8x16xf32>
      %cst_32 = arith.constant dense<0xFF800000> : vector<16xf32>
      %126 = vector.multi_reduction <maximumf>, %125, %cst_32 [0] : vector<8x16xf32> to vector<16xf32>
      %127 = vector.shape_cast %126 : vector<16xf32> to vector<1x16xf32>
      %128 = vector.broadcast %127 : vector<1x16xf32> to vector<8x16xf32>
      %129 = arith.subf %125, %128 : vector<8x16xf32>
      %130 = math.exp %129 : vector<8x16xf32>
      %cst_33 = arith.constant dense<0.000000e+00> : vector<16xf32>
      %131 = vector.multi_reduction <add>, %130, %cst_33 [0] : vector<8x16xf32> to vector<16xf32>
      %132 = vector.shape_cast %131 : vector<16xf32> to vector<1x16xf32>
      %133 = math.log %132 : vector<1x16xf32>
      %134 = arith.addf %127, %133 : vector<1x16xf32>
      %cst_34 = arith.constant -2.77258849 : f32
      %135 = vector.broadcast %cst_34 : f32 to vector<1x16xf32>
      %136 = arith.subf %135, %134 : vector<1x16xf32>
      %137 = vector.broadcast %136 : vector<1x16xf32> to vector<8x16xf32>
      %138 = arith.addf %125, %137 : vector<8x16xf32>
      %cst_35 = arith.constant dense<0xFF800000> : vector<8xf32>
      %139 = vector.multi_reduction <maximumf>, %138, %cst_35 [1] : vector<8x16xf32> to vector<8xf32>
      %140 = vector.shape_cast %139 : vector<8xf32> to vector<8x1xf32>
      %141 = vector.broadcast %140 : vector<8x1xf32> to vector<8x16xf32>
      %142 = arith.subf %138, %141 : vector<8x16xf32>
      %143 = math.exp %142 : vector<8x16xf32>
      %cst_36 = arith.constant dense<0.000000e+00> : vector<8xf32>
      %144 = vector.multi_reduction <add>, %143, %cst_36 [1] : vector<8x16xf32> to vector<8xf32>
      %145 = vector.shape_cast %144 : vector<8xf32> to vector<8x1xf32>
      %146 = math.log %145 : vector<8x1xf32>
      %147 = arith.addf %140, %146 : vector<8x1xf32>
      %cst_37 = arith.constant -2.07944155 : f32
      %148 = vector.broadcast %cst_37 : f32 to vector<8x1xf32>
      %149 = arith.subf %148, %147 : vector<8x1xf32>
      %150 = vector.broadcast %149 : vector<8x1xf32> to vector<8x16xf32>
      %151 = arith.addf %138, %150 : vector<8x16xf32>
      scf.yield %151 : vector<8x16xf32>
    } else {
      scf.yield %33#1 : vector<8x16xf32>
    }
    %38 = math.exp %37 : vector<8x16xf32>
    %39 = arith.mulf %38, %32 : vector<8x16xf32>
    %cst_8 = arith.constant dense<0.000000e+00> : vector<8xf32>
    %40 = vector.multi_reduction <add>, %39, %cst_8 [1] : vector<8x16xf32> to vector<8xf32>
    %41 = vector.shape_cast %40 : vector<8xf32> to vector<8x1xf32>
    %cst_9 = arith.constant dense<0.000000e+00> : vector<1xf32>
    %42 = vector.multi_reduction <add>, %41, %cst_9 [0] : vector<8x1xf32> to vector<1xf32>
    %43 = vector.shape_cast %42 : vector<1xf32> to vector<1x1xf32>
    %cst_10 = arith.constant -1.000000e-01 : f32
    %44 = vector.broadcast %cst_10 : f32 to vector<1x1xf32>
    %45 = arith.mulf %44, %43 : vector<1x1xf32>
    %46 = vector.shape_cast %45 : vector<1x1xf32> to vector<1x1x1xf32>
    %c0_11 = arith.constant 0 : index
    %c0_12 = arith.constant 0 : index
    %c0_13 = arith.constant 0 : index
    %47 = vector.load %arg3[%c0_11, %c0_12, %c0_13] : memref<1x1x1xf32, #tpu.memory_space<vmem>>, vector<1x1x1xf32>
    tpu.vector_store %arg3[%c0_11, %c0_12, %c0_13], %46 {strides = array<i32>} : memref<1x1x1xf32, #tpu.memory_space<vmem>>, vector<1x1x1xf32>,
    return
  }
  func.func @transform_0(%arg0: i32) -> (i32, i32, i32) {
    %c0_i32 = arith.constant 0 : i32
    %c0_i32_0 = arith.constant 0 : i32
    %c0_i32_1 = arith.constant 0 : i32
    return %arg0, %c0_i32, %c0_i32_0 : i32, i32, i32
  }
  func.func @transform_1(%arg0: i32) -> (i32, i32, i32) {
    %c0_i32 = arith.constant 0 : i32
    %c0_i32_0 = arith.constant 0 : i32
    %c0_i32_1 = arith.constant 0 : i32
    return %arg0, %c0_i32, %c0_i32_0 : i32, i32, i32
  }
  func.func @transform_2(%arg0: i32) -> (i32, i32, i32) {
    %c0_i32 = arith.constant 0 : i32
    %c0_i32_0 = arith.constant 0 : i32
    %c0_i32_1 = arith.constant 0 : i32
    return %arg0, %c0_i32, %c0_i32_0 : i32, i32, i32
  }
}

</mosaic_0001>

<bundles_post_ra>
// kernel: tpu_custom_call.1
= control target key start
LH: loop header
LB: loop body
LE: loop exit
PB: predicated region body
PF: predicated region fallthrough
CT: control target
= control target key end

     0   :  { %s951_s9 = smov 0   ;;  %s1069_s0 = inlined_call_operand.vmem [shape: f32[2,8,4], index: 0, kind: input, shape index: {}]   ;;  %s1070_s1 = inlined_call_operand.vmem [shape: f32[2,4,16], index: 1, kind: input, shape index: {}]   ;;  %s1071_s2 = inlined_call_operand.vmem [shape: f32[2,1,1], index: 2, kind: output, shape index: {}]  }
   0x1 LB: > { %s744_s10 = sadd.s32 4294967295, %s918_s9   ;;  %p748_p0 = scmp.ge.s32.totalorder %s918_s9, 1  ;;  %s918_s9 = sphi %s951_s9, %s12_s9  }
   0x2   : > { %p120_p1 = scmp.lt.s32.totalorder %s918_s9, 3 }
   0x4   : > { %p121_p2 = pnand %p748_p0, %p120_p1 }
   0x5   : > { %p143_p3 = scmp.lt.s32.totalorder (!%p121_p2), %s744_s10, 1  ;;  %s978_s22 = smov (!%p121_p2), 0  }
   0x6   : > { %124 = sbr.rel (%p121_p2) target bundleno = 4046 (0xfce), region = 28 }
   0xb   : > { %v932_v0 = vmov 0   ;;  %v933_v1 = vmov 2   ;;  %s1077_s10 = smov (!%p143_p3, %s744_s10), 1  ;;  %v934_v3 = vmov 1   ;;  %v935_v4 = vmov 3  }
   0xc   : > { %797 = vset.pattern.permute.xlu0 %v932_v0  ;;  %799 = vset.pattern.permute.xlu1 %v933_v1  ;;  %s749_s11 = sshll.u32 %s1077_s10, 3  ;;  %s153_s14 = scalar_lea.vmem %s1071_s2, %s1077_s10 }
   0xd   : > { %s146_s17 = scalar_lea.vmem %s1069_s0, %s749_s11  ;;  %s750_s18 = sshll.u32 %s1077_s10, 2 }
   0xe   : > { %v154_v2 = vld [vmem:[%s146_s17] sm:$0xff]  ;;  %s150_s21 = scalar_lea.vmem %s1070_s1, %s750_s18 }
   0xf   : > { %158 = vperm.xlu0 %797, %v154_v2   ;;  %173 = vperm.xlu1 %799, %v154_v2   ;;  %v155_v7 = vld [vmem:[%s150_s21] sm:$0xf] }
  0x10   : > { %v161_v8 = vperm.slane %v155_v7, 0  ;;  %v176_v9 = vperm.slane %v155_v7, 2  ;;  %v168_v10 = vperm.slane %v155_v7, 1  ;;  %v184_v11 = vperm.slane %v155_v7, 3 }
  0x17   : > { %798 = vset.pattern.permute.xlu0 %v934_v3  ;;  %800 = vset.pattern.permute.xlu1 %v935_v4 }
  0x18   : > { %165 = vperm.xlu0 %798, %v154_v2   ;;  %181 = vperm.xlu1 %800, %v154_v2  }
  0x20   : > { %801 = vset.pattern.permute.xlu0 %v935_v4 }
  0x81   : > { %v159_v5 = vpop.permute.xlu0 %158  ;;  %v174_v6 = vpop.permute.xlu1 %173 }
  0x82   : > { %v162_v12 = vsub.f32 %v159_v5, %v161_v8  ;;  %v177_v15 = vsub.f32 %v174_v6, %v176_v9 }
  0x84   : > { %v163_v18 = vmul.f32 %v162_v12, %v162_v12  ;;  %v178_v20 = vmul.f32 %v177_v15, %v177_v15 }
  0x8a   : > { %v166_v13 = vpop.permute.xlu0 %165  ;;  %v182_v14 = vpop.permute.xlu1 %181 }
  0x8b   : > { %v169_v16 = vsub.f32 %v166_v13, %v168_v10  ;;  %v185_v17 = vsub.f32 %v182_v14, %v184_v11 }
  0x8d   : > { %v170_v19 = vmul.f32 %v169_v16, %v169_v16  ;;  %v186_v22 = vmul.f32 %v185_v17, %v185_v17 }
  0x8f   : > { %v171_v21 = vadd.f32 %v170_v19, %v163_v18 }
  0x91   : > { %v179_v23 = vadd.f32 %v178_v20, %v171_v21 }
  0x93   : > { %v187_v24 = vadd.f32 %v186_v22, %v179_v23 }
  0x95   : > { %v973_v25 = vmul.f32 -10.0, %v187_v24  }
  0x97   : > { %v1072_v26 = vmov %v973_v25 }
  0x98 LB: >> { %vm199_vm0 = vcmask 130048   ;;  %vm489_vm1 = vcmask 122880   ;;  %s501_s22 = sadd.s32 1, %s926_s22   ;;  %s926_s22 = sphi %s978_s22, %s501_s22   ;;  %v922_v26 = vphi %v1072_v26, %v1075_v26  }
  0x99   : >> { %v200_v27 = vsel %vm199_vm0, %v922_v26, -inf  ;;  %p193_p4 = scmp.lt.s32.totalorder %s501_s22, 12 }
  0x9a   : >> { %v201_v28 = vrot.slane %v200_v27, 4 }
  0x9c   : >> { %v202_v29 = vmax.f32 %v200_v27, %v201_v28 }
  0x9e   : >> { %v203_v30 = vrot.slane %v202_v29, 2 }
  0xa0   : >> { %v204_v31 = vmax.f32 %v202_v29, %v203_v30 }
  0xa2   : >> { %v205_v32 = vrot.slane %v204_v31, 1 }
  0xa4   : >> { %v206_v33 = vmax.f32 %v204_v31, %v205_v32 }
  0xa6   : >> { %v207_v34 = vsub.f32 %v922_v26, %v206_v33 }
  0xa8   : >> { %v208_v35 = vmul.f32 1.442695, %v207_v34 }
  0xaa   : >> { %802 = vpow2.f32 %v208_v35 }
  0xb0   : >> { %v803_v36 = vpop.eup %802 }
  0xb1   : >> { %v210_v37 = vsel %vm199_vm0, %v803_v36, 0.0 }
  0xb2   : >> { %v211_v38 = vrot.slane %v210_v37, 4 }
  0xb4   : >> { %v212_v39 = vadd.f32 %v211_v38, %v210_v37 }
  0xb6   : >> { %v213_v40 = vrot.slane %v212_v39, 2 }
  0xb8   : >> { %v214_v41 = vadd.f32 %v213_v40, %v212_v39 }
  0xba   : >> { %v215_v42 = vrot.slane %v214_v41, 1 }
  0xbc   : >> { %v216_v43 = vadd.f32 %v215_v42, %v214_v41 }
  0xbe   : >> { %804 = vlog2.f32 %v216_v43 }
  0xc4   : >> { %v805_v44 = vpop.eup %804 }
  0xc5   : >> { %v218_v45 = vmul.f32 0.6931472, %v805_v44 }
  0xc7   : >> { %v219_v46 = vadd.f32 %v218_v45, %v206_v33 }
  0xc9   : >> { %v220_v47 = vsub.f32 -2.7725885, %v219_v46 }
  0xcb   : >> { %v221_v48 = vadd.f32 %v922_v26, %v220_v47 }
  0xcd   : >> { %v222_v49 = vsel %vm199_vm0, %v221_v48, -inf }
  0xce   : >> { %223 = vmax.xlane.f32.xlu0 %v222_v49 }
 0x141   : >> { %v224_v50 = vpop.xlane.xlu0 %223 }
 0x142   : >> { %v225_v51 = vsub.f32 %v221_v48, %v224_v50 }
 0x144   : >> { %v226_v52 = vmul.f32 1.442695, %v225_v51 }
 0x146   : >> { %806 = vpow2.f32 %v226_v52 }
 0x14c   : >> { %v807_v53 = vpop.eup %806 }
 0x14d   : >> { %v228_v54 = vsel %vm199_vm0, %v807_v53, 0.0 }
 0x14e   : >> { %229 = vadd.xlane.f32.xlu0 %v228_v54 }
 0x1c1   : >> { %v230_v55 = vpop.xlane.xlu0 %229 }
 0x1c2   : >> { %808 = vlog2.f32 %v230_v55 }
 0x1c8   : >> { %v809_v56 = vpop.eup %808 }
 0x1c9   : >> { %v232_v57 = vmul.f32 0.6931472, %v809_v56 }
 0x1cb   : >> { %v233_v58 = vadd.f32 %v232_v57, %v224_v50 }
 0x1cd   : >> { %v234_v59 = vsub.f32 -2.0794415, %v233_v58 }
 0x1cf   : >> { %v235_v60 = vadd.f32 %v234_v59, %v221_v48 }
 0x1d1   : >> { %v236_v61 = vsel %vm199_vm0, %v235_v60, -inf }
 0x1d2   : >> { %v237_v62 = vrot.slane %v236_v61, 4 }
 0x1d4   : >> { %v238_v63 = vmax.f32 %v236_v61, %v237_v62 }
 0x1d6   : >> { %v239_v0 = vrot.slane %v238_v63, 2 }
 0x1d8   : >> { %v240_v1 = vmax.f32 %v238_v63, %v239_v0 }
 0x1da   : >> { %v241_v2 = vrot.slane %v240_v1, 1 }
 0x1dc   : >> { %v242_v3 = vmax.f32 %v240_v1, %v241_v2 }
 0x1de   : >> { %v243_v4 = vsub.f32 %v235_v60, %v242_v3 }
 0x1e0   : >> { %v244_v5 = vmul.f32 1.442695, %v243_v4 }
 0x1e2   : >> { %810 = vpow2.f32 %v244_v5 }
 0x1e8   : >> { %v811_v6 = vpop.eup %810 }
 0x1e9   : >> { %v246_v7 = vsel %vm199_vm0, %v811_v6, 0.0 }
 0x1ea   : >> { %v247_v8 = vrot.slane %v246_v7, 4 }
 0x1ec   : >> { %v248_v9 = vadd.f32 %v247_v8, %v246_v7 }
 0x1ee   : >> { %v249_v10 = vrot.slane %v248_v9, 2 }
 0x1f0   : >> { %v250_v11 = vadd.f32 %v249_v10, %v248_v9 }
 0x1f2   : >> { %v251_v12 = vrot.slane %v250_v11, 1 }
 0x1f4   : >> { %v252_v13 = vadd.f32 %v251_v12, %v250_v11 }
 0x1f6   : >> { %812 = vlog2.f32 %v252_v13 }
 0x1fc   : >> { %v813_v14 = vpop.eup %812 }
 0x1fd   : >> { %v254_v15 = vmul.f32 0.6931472, %v813_v14 }
 0x1ff   : >> { %v255_v16 = vadd.f32 %v254_v15, %v242_v3 }
 0x201   : >> { %v256_v17 = vsub.f32 -2.7725885, %v255_v16 }
 0x203   : >> { %v257_v18 = vadd.f32 %v256_v17, %v235_v60 }
 0x205   : >> { %v258_v19 = vsel %vm199_vm0, %v257_v18, -inf }
 0x206   : >> { %259 = vmax.xlane.f32.xlu1 %v258_v19 }
 0x279   : >> { %v260_v20 = vpop.xlane.xlu1 %259 }
 0x27a   : >> { %v261_v21 = vsub.f32 %v257_v18, %v260_v20 }
 0x27c   : >> { %v262_v22 = vmul.f32 1.442695, %v261_v21 }
 0x27e   : >> { %814 = vpow2.f32 %v262_v22 }
 0x284   : >> { %v815_v23 = vpop.eup %814 }
 0x285   : >> { %v264_v24 = vsel %vm199_vm0, %v815_v23, 0.0 }
 0x286   : >> { %265 = vadd.xlane.f32.xlu1 %v264_v24 }
 0x2f9   : >> { %v266_v26 = vpop.xlane.xlu1 %265 }
 0x2fa   : >> { %816 = vlog2.f32 %v266_v26 }
 0x300   : >> { %v817_v27 = vpop.eup %816 }
 0x301   : >> { %v268_v28 = vmul.f32 0.6931472, %v817_v27 }
 0x303   : >> { %v269_v29 = vadd.f32 %v268_v28, %v260_v20 }
 0x305   : >> { %v270_v30 = vsub.f32 -2.0794415, %v269_v29 }
 0x307   : >> { %v271_v31 = vadd.f32 %v270_v30, %v257_v18 }
 0x309   : >> { %v272_v32 = vsel %vm199_vm0, %v271_v31, -inf }
 0x30a   : >> { %v273_v33 = vrot.slane %v272_v32, 4 }
 0x30c   : >> { %v274_v34 = vmax.f32 %v272_v32, %v273_v33 }
 0x30e   : >> { %v275_v35 = vrot.slane %v274_v34, 2 }
 0x310   : >> { %v276_v36 = vmax.f32 %v274_v34, %v275_v35 }
 0x312   : >> { %v277_v37 = vrot.slane %v276_v36, 1 }
 0x314   : >> { %v278_v38 = vmax.f32 %v276_v36, %v277_v37 }
 0x316   : >> { %v279_v39 = vsub.f32 %v271_v31, %v278_v38 }
 0x318   : >> { %v280_v40 = vmul.f32 1.442695, %v279_v39 }
 0x31a   : >> { %818 = vpow2.f32 %v280_v40 }
 0x320   : >> { %v819_v41 = vpop.eup %818 }
 0x321   : >> { %v282_v42 = vsel %vm199_vm0, %v819_v41, 0.0 }
 0x322   : >> { %v283_v43 = vrot.slane %v282_v42, 4 }
 0x324   : >> { %v284_v44 = vadd.f32 %v283_v43, %v282_v42 }
 0x326   : >> { %v285_v45 = vrot.slane %v284_v44, 2 }
 0x328   : >> { %v286_v46 = vadd.f32 %v285_v45, %v284_v44 }
 0x32a   : >> { %v287_v47 = vrot.slane %v286_v46, 1 }
 0x32c   : >> { %v288_v48 = vadd.f32 %v287_v47, %v286_v46 }
 0x32e   : >> { %820 = vlog2.f32 %v288_v48 }
 0x334   : >> { %v821_v49 = vpop.eup %820 }
 0x335   : >> { %v290_v50 = vmul.f32 0.6931472, %v821_v49 }
 0x337   : >> { %v291_v51 = vadd.f32 %v290_v50, %v278_v38 }
 0x339   : >> { %v292_v52 = vsub.f32 -2.7725885, %v291_v51 }
 0x33b   : >> { %v293_v53 = vadd.f32 %v292_v52, %v271_v31 }
 0x33d   : >> { %v294_v54 = vsel %vm199_vm0, %v293_v53, -inf }
 0x33e   : >> { %295 = vmax.xlane.f32.xlu2 %v294_v54 }
 0x3b1   : >> { %v296_v55 = vpop.xlane.xlu2 %295 }
 0x3b2   : >> { %v297_v56 = vsub.f32 %v293_v53, %v296_v55 }
 0x3b4   : >> { %v298_v57 = vmul.f32 1.442695, %v297_v56 }
 0x3b6   : >> { %822 = vpow2.f32 %v298_v57 }
 0x3bc   : >> { %v823_v58 = vpop.eup %822 }
 0x3bd   : >> { %v300_v59 = vsel %vm199_vm0, %v823_v58, 0.0 }
 0x3be   : >> { %301 = vadd.xlane.f32.xlu2 %v300_v59 }
 0x431   : >> { %v302_v60 = vpop.xlane.xlu2 %301 }
 0x432   : >> { %824 = vlog2.f32 %v302_v60 }
 0x438   : >> { %v825_v61 = vpop.eup %824 }
 0x439   : >> { %v304_v62 = vmul.f32 0.6931472, %v825_v61 }
 0x43b   : >> { %v305_v63 = vadd.f32 %v304_v62, %v296_v55 }
 0x43d   : >> { %v306_v0 = vsub.f32 -2.0794415, %v305_v63 }
 0x43f   : >> { %v307_v1 = vadd.f32 %v306_v0, %v293_v53 }
 0x441   : >> { %v308_v2 = vsel %vm199_vm0, %v307_v1, -inf }
 0x442   : >> { %v309_v3 = vrot.slane %v308_v2, 4 }
 0x444   : >> { %v310_v4 = vmax.f32 %v308_v2, %v309_v3 }
 0x446   : >> { %v311_v5 = vrot.slane %v310_v4, 2 }
 0x448   : >> { %v312_v6 = vmax.f32 %v310_v4, %v311_v5 }
 0x44a   : >> { %v313_v7 = vrot.slane %v312_v6, 1 }
 0x44c   : >> { %v314_v8 = vmax.f32 %v312_v6, %v313_v7 }
 0x44e   : >> { %v315_v9 = vsub.f32 %v307_v1, %v314_v8 }
 0x450   : >> { %v316_v10 = vmul.f32 1.442695, %v315_v9 }
 0x452   : >> { %826 = vpow2.f32 %v316_v10 }
 0x458   : >> { %v827_v11 = vpop.eup %826 }
 0x459   : >> { %v318_v12 = vsel %vm199_vm0, %v827_v11, 0.0 }
 0x45a   : >> { %v319_v13 = vrot.slane %v318_v12, 4 }
 0x45c   : >> { %v320_v14 = vadd.f32 %v319_v13, %v318_v12 }
 0x45e   : >> { %v321_v15 = vrot.slane %v320_v14, 2 }
 0x460   : >> { %v322_v16 = vadd.f32 %v321_v15, %v320_v14 }
 0x462   : >> { %v323_v17 = vrot.slane %v322_v16, 1 }
 0x464   : >> { %v324_v18 = vadd.f32 %v323_v17, %v322_v16 }
 0x466   : >> { %828 = vlog2.f32 %v324_v18 }
 0x46c   : >> { %v829_v19 = vpop.eup %828 }
 0x46d   : >> { %v326_v20 = vmul.f32 0.6931472, %v829_v19 }
 0x46f   : >> { %v327_v21 = vadd.f32 %v326_v20, %v314_v8 }
 0x471   : >> { %v328_v22 = vsub.f32 -2.7725885, %v327_v21 }
 0x473   : >> { %v329_v23 = vadd.f32 %v328_v22, %v307_v1 }
 0x475   : >> { %v330_v24 = vsel %vm199_vm0, %v329_v23, -inf }
 0x476   : >> { %331 = vmax.xlane.f32.xlu0 %v330_v24 }
 0x4e9   : >> { %v332_v26 = vpop.xlane.xlu0 %331 }
 0x4ea   : >> { %v333_v27 = vsub.f32 %v329_v23, %v332_v26 }
 0x4ec   : >> { %v334_v28 = vmul.f32 1.442695, %v333_v27 }
 0x4ee   : >> { %830 = vpow2.f32 %v334_v28 }
 0x4f4   : >> { %v831_v29 = vpop.eup %830 }
 0x4f5   : >> { %v336_v30 = vsel %vm199_vm0, %v831_v29, 0.0 }
 0x4f6   : >> { %337 = vadd.xlane.f32.xlu1 %v336_v30 }
 0x569   : >> { %v338_v31 = vpop.xlane.xlu1 %337 }
 0x56a   : >> { %832 = vlog2.f32 %v338_v31 }
 0x570   : >> { %v833_v32 = vpop.eup %832 }
 0x571   : >> { %v340_v33 = vmul.f32 0.6931472, %v833_v32 }
 0x573   : >> { %v341_v34 = vadd.f32 %v340_v33, %v332_v26 }
 0x575   : >> { %v342_v35 = vsub.f32 -2.0794415, %v341_v34 }
 0x577   : >> { %v343_v36 = vadd.f32 %v342_v35, %v329_v23 }
 0x579   : >> { %v344_v37 = vsel %vm199_vm0, %v343_v36, -inf }
 0x57a   : >> { %v345_v38 = vrot.slane %v344_v37, 4 }
 0x57c   : >> { %v346_v39 = vmax.f32 %v344_v37, %v345_v38 }
 0x57e   : >> { %v347_v40 = vrot.slane %v346_v39, 2 }
 0x580   : >> { %v348_v41 = vmax.f32 %v346_v39, %v347_v40 }
 0x582   : >> { %v349_v42 = vrot.slane %v348_v41, 1 }
 0x584   : >> { %v350_v43 = vmax.f32 %v348_v41, %v349_v42 }
 0x586   : >> { %v351_v44 = vsub.f32 %v343_v36, %v350_v43 }
 0x588   : >> { %v352_v45 = vmul.f32 1.442695, %v351_v44 }
 0x58a   : >> { %834 = vpow2.f32 %v352_v45 }
 0x590   : >> { %v835_v46 = vpop.eup %834 }
 0x591   : >> { %v354_v47 = vsel %vm199_vm0, %v835_v46, 0.0 }
 0x592   : >> { %v355_v48 = vrot.slane %v354_v47, 4 }
 0x594   : >> { %v356_v49 = vadd.f32 %v355_v48, %v354_v47 }
 0x596   : >> { %v357_v50 = vrot.slane %v356_v49, 2 }
 0x598   : >> { %v358_v51 = vadd.f32 %v357_v50, %v356_v49 }
 0x59a   : >> { %v359_v52 = vrot.slane %v358_v51, 1 }
 0x59c   : >> { %v360_v53 = vadd.f32 %v359_v52, %v358_v51 }
 0x59e   : >> { %836 = vlog2.f32 %v360_v53 }
 0x5a4   : >> { %v837_v54 = vpop.eup %836 }
 0x5a5   : >> { %v362_v55 = vmul.f32 0.6931472, %v837_v54 }
 0x5a7   : >> { %v363_v56 = vadd.f32 %v362_v55, %v350_v43 }
 0x5a9   : >> { %v364_v57 = vsub.f32 -2.7725885, %v363_v56 }
 0x5ab   : >> { %v365_v58 = vadd.f32 %v364_v57, %v343_v36 }
 0x5ad   : >> { %v366_v59 = vsel %vm199_vm0, %v365_v58, -inf }
 0x5ae   : >> { %367 = vmax.xlane.f32.xlu2 %v366_v59 }
 0x621   : >> { %v368_v60 = vpop.xlane.xlu2 %367 }
 0x622   : >> { %v369_v61 = vsub.f32 %v365_v58, %v368_v60 }
 0x624   : >> { %v370_v62 = vmul.f32 1.442695, %v369_v61 }
 0x626   : >> { %838 = vpow2.f32 %v370_v62 }
 0x62c   : >> { %v839_v63 = vpop.eup %838 }
 0x62d   : >> { %v372_v0 = vsel %vm199_vm0, %v839_v63, 0.0 }
 0x62e   : >> { %373 = vadd.xlane.f32.xlu0 %v372_v0 }
 0x6a1   : >> { %v374_v1 = vpop.xlane.xlu0 %373 }
 0x6a2   : >> { %840 = vlog2.f32 %v374_v1 }
 0x6a8   : >> { %v841_v2 = vpop.eup %840 }
 0x6a9   : >> { %v376_v3 = vmul.f32 0.6931472, %v841_v2 }
 0x6ab   : >> { %v377_v4 = vadd.f32 %v376_v3, %v368_v60 }
 0x6ad   : >> { %v378_v5 = vsub.f32 -2.0794415, %v377_v4 }
 0x6af   : >> { %v379_v6 = vadd.f32 %v378_v5, %v365_v58 }
 0x6b1   : >> { %v380_v7 = vsel %vm199_vm0, %v379_v6, -inf }
 0x6b2   : >> { %v381_v8 = vrot.slane %v380_v7, 4 }
 0x6b4   : >> { %v382_v9 = vmax.f32 %v380_v7, %v381_v8 }
 0x6b6   : >> { %v383_v10 = vrot.slane %v382_v9, 2 }
 0x6b8   : >> { %v384_v11 = vmax.f32 %v382_v9, %v383_v10 }
 0x6ba   : >> { %v385_v12 = vrot.slane %v384_v11, 1 }
 0x6bc   : >> { %v386_v13 = vmax.f32 %v384_v11, %v385_v12 }
 0x6be   : >> { %v387_v14 = vsub.f32 %v379_v6, %v386_v13 }
 0x6c0   : >> { %v388_v15 = vmul.f32 1.442695, %v387_v14 }
 0x6c2   : >> { %842 = vpow2.f32 %v388_v15 }
 0x6c8   : >> { %v843_v16 = vpop.eup %842 }
 0x6c9   : >> { %v390_v17 = vsel %vm199_vm0, %v843_v16, 0.0 }
 0x6ca   : >> { %v391_v18 = vrot.slane %v390_v17, 4 }
 0x6cc   : >> { %v392_v19 = vadd.f32 %v391_v18, %v390_v17 }
 0x6ce   : >> { %v393_v20 = vrot.slane %v392_v19, 2 }
 0x6d0   : >> { %v394_v21 = vadd.f32 %v393_v20, %v392_v19 }
 0x6d2   : >> { %v395_v22 = vrot.slane %v394_v21, 1 }
 0x6d4   : >> { %v396_v23 = vadd.f32 %v395_v22, %v394_v21 }
 0x6d6   : >> { %844 = vlog2.f32 %v396_v23 }
 0x6dc   : >> { %v845_v24 = vpop.eup %844 }
 0x6dd   : >> { %v398_v26 = vmul.f32 0.6931472, %v845_v24 }
 0x6df   : >> { %v399_v27 = vadd.f32 %v398_v26, %v386_v13 }
 0x6e1   : >> { %v400_v28 = vsub.f32 -2.7725885, %v399_v27 }
 0x6e3   : >> { %v401_v29 = vadd.f32 %v400_v28, %v379_v6 }
 0x6e5   : >> { %v402_v30 = vsel %vm199_vm0, %v401_v29, -inf }
 0x6e6   : >> { %403 = vmax.xlane.f32.xlu1 %v402_v30 }
 0x759   : >> { %v404_v31 = vpop.xlane.xlu1 %403 }
 0x75a   : >> { %v405_v32 = vsub.f32 %v401_v29, %v404_v31 }
 0x75c   : >> { %v406_v33 = vmul.f32 1.442695, %v405_v32 }
 0x75e   : >> { %846 = vpow2.f32 %v406_v33 }
 0x764   : >> { %v847_v34 = vpop.eup %846 }
 0x765   : >> { %v408_v35 = vsel %vm199_vm0, %v847_v34, 0.0 }
 0x766   : >> { %409 = vadd.xlane.f32.xlu2 %v408_v35 }
 0x7d9   : >> { %v410_v36 = vpop.xlane.xlu2 %409 }
 0x7da   : >> { %848 = vlog2.f32 %v410_v36 }
 0x7e0   : >> { %v849_v37 = vpop.eup %848 }
 0x7e1   : >> { %v412_v38 = vmul.f32 0.6931472, %v849_v37 }
 0x7e3   : >> { %v413_v39 = vadd.f32 %v412_v38, %v404_v31 }
 0x7e5   : >> { %v414_v40 = vsub.f32 -2.0794415, %v413_v39 }
 0x7e7   : >> { %v415_v41 = vadd.f32 %v414_v40, %v401_v29 }
 0x7e9   : >> { %v416_v42 = vsel %vm199_vm0, %v415_v41, -inf }
 0x7ea   : >> { %v417_v43 = vrot.slane %v416_v42, 4 }
 0x7ec   : >> { %v418_v44 = vmax.f32 %v416_v42, %v417_v43 }
 0x7ee   : >> { %v419_v45 = vrot.slane %v418_v44, 2 }
 0x7f0   : >> { %v420_v46 = vmax.f32 %v418_v44, %v419_v45 }
 0x7f2   : >> { %v421_v47 = vrot.slane %v420_v46, 1 }
 0x7f4   : >> { %v422_v48 = vmax.f32 %v420_v46, %v421_v47 }
 0x7f6   : >> { %v423_v49 = vsub.f32 %v415_v41, %v422_v48 }
 0x7f8   : >> { %v424_v50 = vmul.f32 1.442695, %v423_v49 }
 0x7fa   : >> { %850 = vpow2.f32 %v424_v50 }
 0x800   : >> { %v851_v51 = vpop.eup %850 }
 0x801   : >> { %v426_v52 = vsel %vm199_vm0, %v851_v51, 0.0 }
 0x802   : >> { %v427_v53 = vrot.slane %v426_v52, 4 }
 0x804   : >> { %v428_v54 = vadd.f32 %v427_v53, %v426_v52 }
 0x806   : >> { %v429_v55 = vrot.slane %v428_v54, 2 }
 0x808   : >> { %v430_v56 = vadd.f32 %v429_v55, %v428_v54 }
 0x80a   : >> { %v431_v57 = vrot.slane %v430_v56, 1 }
 0x80c   : >> { %v432_v58 = vadd.f32 %v431_v57, %v430_v56 }
 0x80e   : >> { %852 = vlog2.f32 %v432_v58 }
 0x814   : >> { %v853_v59 = vpop.eup %852 }
 0x815   : >> { %v434_v60 = vmul.f32 0.6931472, %v853_v59 }
 0x817   : >> { %v435_v61 = vadd.f32 %v434_v60, %v422_v48 }
 0x819   : >> { %v436_v62 = vsub.f32 -2.7725885, %v435_v61 }
 0x81b   : >> { %v437_v63 = vadd.f32 %v436_v62, %v415_v41 }
 0x81d   : >> { %v438_v0 = vsel %vm199_vm0, %v437_v63, -inf }
 0x81e   : >> { %439 = vmax.xlane.f32.xlu0 %v438_v0 }
 0x891   : >> { %v440_v1 = vpop.xlane.xlu0 %439 }
 0x892   : >> { %v441_v2 = vsub.f32 %v437_v63, %v440_v1 }
 0x894   : >> { %v442_v3 = vmul.f32 1.442695, %v441_v2 }
 0x896   : >> { %854 = vpow2.f32 %v442_v3 }
 0x89c   : >> { %v855_v4 = vpop.eup %854 }
 0x89d   : >> { %v444_v5 = vsel %vm199_vm0, %v855_v4, 0.0 }
 0x89e   : >> { %445 = vadd.xlane.f32.xlu1 %v444_v5 }
 0x911   : >> { %v446_v6 = vpop.xlane.xlu1 %445 }
 0x912   : >> { %856 = vlog2.f32 %v446_v6 }
 0x918   : >> { %v857_v7 = vpop.eup %856 }
 0x919   : >> { %v448_v8 = vmul.f32 0.6931472, %v857_v7 }
 0x91b   : >> { %v449_v9 = vadd.f32 %v448_v8, %v440_v1 }
 0x91d   : >> { %v450_v10 = vsub.f32 -2.0794415, %v449_v9 }
 0x91f   : >> { %v451_v11 = vadd.f32 %v450_v10, %v437_v63 }
 0x921   : >> { %v452_v12 = vsel %vm199_vm0, %v451_v11, -inf }
 0x922   : >> { %v453_v13 = vrot.slane %v452_v12, 4 }
 0x924   : >> { %v454_v14 = vmax.f32 %v452_v12, %v453_v13 }
 0x926   : >> { %v455_v15 = vrot.slane %v454_v14, 2 }
 0x928   : >> { %v456_v16 = vmax.f32 %v454_v14, %v455_v15 }
 0x92a   : >> { %v457_v17 = vrot.slane %v456_v16, 1 }
 0x92c   : >> { %v458_v18 = vmax.f32 %v456_v16, %v457_v17 }
 0x92e   : >> { %v459_v19 = vsub.f32 %v451_v11, %v458_v18 }
 0x930   : >> { %v460_v20 = vmul.f32 1.442695, %v459_v19 }
 0x932   : >> { %858 = vpow2.f32 %v460_v20 }
 0x938   : >> { %v859_v21 = vpop.eup %858 }
 0x939   : >> { %v462_v22 = vsel %vm199_vm0, %v859_v21, 0.0 }
 0x93a   : >> { %v463_v23 = vrot.slane %v462_v22, 4 }
 0x93c   : >> { %v464_v24 = vadd.f32 %v463_v23, %v462_v22 }
 0x93e   : >> { %v465_v26 = vrot.slane %v464_v24, 2 }
 0x940   : >> { %v466_v27 = vadd.f32 %v465_v26, %v464_v24 }
 0x942   : >> { %v467_v28 = vrot.slane %v466_v27, 1 }
 0x944   : >> { %v468_v29 = vadd.f32 %v467_v28, %v466_v27 }
 0x946   : >> { %860 = vlog2.f32 %v468_v29 }
 0x94c   : >> { %v861_v30 = vpop.eup %860 }
 0x94d   : >> { %v470_v31 = vmul.f32 0.6931472, %v861_v30 }
 0x94f   : >> { %v471_v32 = vadd.f32 %v470_v31, %v458_v18 }
 0x951   : >> { %v472_v33 = vsub.f32 -2.7725885, %v471_v32 }
 0x953   : >> { %v488_v34 = vand.u32 2147483647, %v472_v33  ;;  %v473_v35 = vadd.f32 %v472_v33, %v451_v11 }
 0x955   : >> { %v490_v36 = vsel %vm489_vm1, %v488_v34, 0.0  ;;  %v474_v37 = vsel %vm199_vm0, %v473_v35, -inf }
 0x956   : >> { %491 = vadd.xlane.f32.xlu0 %v490_v36  ;;  %475 = vmax.xlane.f32.xlu2 %v474_v37 }
 0x9c9   : >> { %v492_v38 = vpop.xlane.xlu0 %491  ;;  %v476_v39 = vpop.xlane.xlu2 %475 }
 0x9ca   : >> { %v493_v40 = vrot.slane %v492_v38, 4  ;;  %v477_v41 = vsub.f32 %v473_v35, %v476_v39 }
 0x9cc   : >> { %v494_v42 = vadd.f32 %v493_v40, %v492_v38  ;;  %v478_v43 = vmul.f32 1.442695, %v477_v41 }
 0x9ce   : >> { %v495_v44 = vrot.slane %v494_v42, 2  ;;  %862 = vpow2.f32 %v478_v43 }
 0x9d0   : >> { %v496_v45 = vadd.f32 %v495_v44, %v494_v42 }
 0x9d2   : >> { %v497_v46 = vrot.slane %v496_v45, 1 }
 0x9d4   : >> { %v863_v47 = vpop.eup %862  ;;  %v498_v48 = vadd.f32 %v497_v46, %v496_v45 }
 0x9d5   : >> { %v480_v49 = vsel %vm199_vm0, %v863_v47, 0.0 }
 0x9d6   : >> { %753 = vpush %v498_v48  ;;  %481 = vadd.xlane.f32.xlu1 %v480_v49 }
 0xa07   : >> { %s754_s23 = spop %753 }
 0xa08   : >> { %s500_s24 = smul.f32 0.1, %s754_s23 }
 0xa0a   : >> { %p1019_p5 = scmp.ge.f32.partialorder %s500_s24, 0.1 }
 0xa0c   : >> { %p195_p6 = pnand %p1019_p5, %p193_p4 }
 0xa0d   : > { %v1030_v56 = vmov (%p195_p6), 0  }
 0xa49   : >> { %v482_v50 = vpop.xlane.xlu1 %481 }
 0xa4a   : >> { %864 = vlog2.f32 %v482_v50 }
 0xa50   : >> { %v865_v51 = vpop.eup %864 }
 0xa51   : >> { %v484_v52 = vmul.f32 0.6931472, %v865_v51 }
 0xa53   : >> { %v485_v53 = vadd.f32 %v484_v52, %v476_v39 }
 0xa55   : >> { %v486_v54 = vsub.f32 -2.0794415, %v485_v53 }
 0xa56   : > { %198 = sbr.rel (!%p195_p6) target bundleno = 152 (0x98), region = 76 }
 0xa57   : >> { %v1017_v26 = vadd.f32 %v486_v54, %v473_v35  }
 0xa59   : >> { %v1073_v55 = vmov %v1017_v26 }
 0xa5a   : >> { %v1075_v26 = vmov %v1073_v55 }
 0xa5b   : > { %505 = sbr.rel (!%p1019_p5) target bundleno = 3898 (0xf3a), region = 39  ;;  %v507_v57 = vsel (%p1019_p5), %vm199_vm0, %v1073_v55, -inf }
 0xa5c   : > { %v508_v58 = vrot.slane (%p1019_p5), %v507_v57, 4 }
 0xa5e   : > { %v509_v59 = vmax.f32 (%p1019_p5), %v507_v57, %v508_v58 }
 0xa60   : > { %v510_v60 = vrot.slane %v509_v59, 2 }
 0xa62   : > { %v511_v61 = vmax.f32 %v509_v59, %v510_v60 }
 0xa64   : > { %v512_v62 = vrot.slane %v511_v61, 1 }
 0xa66   : > { %v513_v63 = vmax.f32 %v511_v61, %v512_v62 }
 0xa68   : > { %v514_v0 = vsub.f32 %v1073_v55, %v513_v63 }
 0xa6a   : > { %v515_v1 = vmul.f32 1.442695, %v514_v0 }
 0xa6c   : > { %866 = vpow2.f32 %v515_v1 }
 0xa72   : > { %v867_v2 = vpop.eup %866 }
 0xa73   : > { %v517_v3 = vsel %vm199_vm0, %v867_v2, 0.0 }
 0xa74   : > { %v518_v4 = vrot.slane %v517_v3, 4 }
 0xa76   : > { %v519_v5 = vadd.f32 %v518_v4, %v517_v3 }
 0xa78   : > { %v520_v6 = vrot.slane %v519_v5, 2 }
 0xa7a   : > { %v521_v7 = vadd.f32 %v520_v6, %v519_v5 }
 0xa7c   : > { %v522_v8 = vrot.slane %v521_v7, 1 }
 0xa7e   : > { %v523_v9 = vadd.f32 %v522_v8, %v521_v7 }
 0xa80   : > { %868 = vlog2.f32 %v523_v9 }
 0xa86   : > { %v869_v10 = vpop.eup %868 }
 0xa87   : > { %v525_v11 = vmul.f32 0.6931472, %v869_v10 }
 0xa89   : > { %v526_v12 = vadd.f32 %v525_v11, %v513_v63 }
 0xa8b   : > { %v527_v13 = vsub.f32 -2.7725885, %v526_v12 }
 0xa8d   : > { %v528_v14 = vadd.f32 %v527_v13, %v1073_v55 }
 0xa8f   : > { %v529_v15 = vsel %vm199_vm0, %v528_v14, -inf }
 0xa90   : > { %530 = vmax.xlane.f32.xlu0 %v529_v15 }
 0xb03   : > { %v531_v16 = vpop.xlane.xlu0 %530 }
 0xb04   : > { %v532_v17 = vsub.f32 %v528_v14, %v531_v16 }
 0xb06   : > { %v533_v18 = vmul.f32 1.442695, %v532_v17 }
 0xb08   : > { %870 = vpow2.f32 %v533_v18 }
 0xb0e   : > { %v871_v19 = vpop.eup %870 }
 0xb0f   : > { %v535_v20 = vsel %vm199_vm0, %v871_v19, 0.0 }
 0xb10   : > { %536 = vadd.xlane.f32.xlu0 %v535_v20 }
 0xb83   : > { %v537_v21 = vpop.xlane.xlu0 %536 }
 0xb84   : > { %872 = vlog2.f32 %v537_v21 }
 0xb8a   : > { %v873_v22 = vpop.eup %872 }
 0xb8b   : > { %v539_v23 = vmul.f32 0.6931472, %v873_v22 }
 0xb8d   : > { %v540_v24 = vadd.f32 %v539_v23, %v531_v16 }
 0xb8f   : > { %v541_v26 = vsub.f32 -2.0794415, %v540_v24 }
 0xb91   : > { %v542_v27 = vadd.f32 %v541_v26, %v528_v14 }
 0xb93   : > { %v543_v28 = vsel %vm199_vm0, %v542_v27, -inf }
 0xb94   : > { %v544_v29 = vrot.slane %v543_v28, 4 }
 0xb96   : > { %v545_v30 = vmax.f32 %v543_v28, %v544_v29 }
 0xb98   : > { %v546_v31 = vrot.slane %v545_v30, 2 }
 0xb9a   : > { %v547_v32 = vmax.f32 %v545_v30, %v546_v31 }
 0xb9c   : > { %v548_v33 = vrot.slane %v547_v32, 1 }
 0xb9e   : > { %v549_v34 = vmax.f32 %v547_v32, %v548_v33 }
 0xba0   : > { %v550_v35 = vsub.f32 %v542_v27, %v549_v34 }
 0xba2   : > { %v551_v36 = vmul.f32 1.442695, %v550_v35 }
 0xba4   : > { %874 = vpow2.f32 %v551_v36 }
 0xbaa   : > { %v875_v37 = vpop.eup %874 }
 0xbab   : > { %v553_v38 = vsel %vm199_vm0, %v875_v37, 0.0 }
 0xbac   : > { %v554_v39 = vrot.slane %v553_v38, 4 }
 0xbae   : > { %v555_v40 = vadd.f32 %v554_v39, %v553_v38 }
 0xbb0   : > { %v556_v41 = vrot.slane %v555_v40, 2 }
 0xbb2   : > { %v557_v42 = vadd.f32 %v556_v41, %v555_v40 }
 0xbb4   : > { %v558_v43 = vrot.slane %v557_v42, 1 }
 0xbb6   : > { %v559_v44 = vadd.f32 %v558_v43, %v557_v42 }
 0xbb8   : > { %876 = vlog2.f32 %v559_v44 }
 0xbbe   : > { %v877_v45 = vpop.eup %876 }
 0xbbf   : > { %v561_v46 = vmul.f32 0.6931472, %v877_v45 }
 0xbc1   : > { %v562_v47 = vadd.f32 %v561_v46, %v549_v34 }
 0xbc3   : > { %v563_v48 = vsub.f32 -2.7725885, %v562_v47 }
 0xbc5   : > { %v564_v49 = vadd.f32 %v563_v48, %v542_v27 }
 0xbc7   : > { %v565_v50 = vsel %vm199_vm0, %v564_v49, -inf }
 0xbc8   : > { %566 = vmax.xlane.f32.xlu1 %v565_v50 }
 0xc3b   : > { %v567_v51 = vpop.xlane.xlu1 %566 }
 0xc3c   : > { %v568_v52 = vsub.f32 %v564_v49, %v567_v51 }
 0xc3e   : > { %v569_v53 = vmul.f32 1.442695, %v568_v52 }
 0xc40   : > { %878 = vpow2.f32 %v569_v53 }
 0xc46   : > { %v879_v54 = vpop.eup %878 }
 0xc47   : > { %v571_v56 = vsel %vm199_vm0, %v879_v54, 0.0 }
 0xc48   : > { %572 = vadd.xlane.f32.xlu1 %v571_v56 }
 0xcbb   : > { %v573_v57 = vpop.xlane.xlu1 %572 }
 0xcbc   : > { %880 = vlog2.f32 %v573_v57 }
 0xcc2   : > { %v881_v58 = vpop.eup %880 }
 0xcc3   : > { %v575_v59 = vmul.f32 0.6931472, %v881_v58 }
 0xcc5   : > { %v576_v60 = vadd.f32 %v575_v59, %v567_v51 }
 0xcc7   : > { %v577_v61 = vsub.f32 -2.0794415, %v576_v60 }
 0xcc9   : > { %v578_v62 = vadd.f32 %v577_v61, %v564_v49 }
 0xccb   : > { %v579_v63 = vsel %vm199_vm0, %v578_v62, -inf }
 0xccc   : > { %v580_v0 = vrot.slane %v579_v63, 4 }
 0xcce   : > { %v581_v1 = vmax.f32 %v579_v63, %v580_v0 }
 0xcd0   : > { %v582_v2 = vrot.slane %v581_v1, 2 }
 0xcd2   : > { %v583_v3 = vmax.f32 %v581_v1, %v582_v2 }
 0xcd4   : > { %v584_v4 = vrot.slane %v583_v3, 1 }
 0xcd6   : > { %v585_v5 = vmax.f32 %v583_v3, %v584_v4 }
 0xcd8   : > { %v586_v6 = vsub.f32 %v578_v62, %v585_v5 }
 0xcda   : > { %v587_v7 = vmul.f32 1.442695, %v586_v6 }
 0xcdc   : > { %882 = vpow2.f32 %v587_v7 }
 0xce2   : > { %v883_v8 = vpop.eup %882 }
 0xce3   : > { %v589_v9 = vsel %vm199_vm0, %v883_v8, 0.0 }
 0xce4   : > { %v590_v10 = vrot.slane %v589_v9, 4 }
 0xce6   : > { %v591_v11 = vadd.f32 %v590_v10, %v589_v9 }
 0xce8   : > { %v592_v12 = vrot.slane %v591_v11, 2 }
 0xcea   : > { %v593_v13 = vadd.f32 %v592_v12, %v591_v11 }
 0xcec   : > { %v594_v14 = vrot.slane %v593_v13, 1 }
 0xcee   : > { %v595_v15 = vadd.f32 %v594_v14, %v593_v13 }
 0xcf0   : > { %884 = vlog2.f32 %v595_v15 }
 0xcf6   : > { %v885_v16 = vpop.eup %884 }
 0xcf7   : > { %v597_v17 = vmul.f32 0.6931472, %v885_v16 }
 0xcf9   : > { %v598_v18 = vadd.f32 %v597_v17, %v585_v5 }
 0xcfb   : > { %v599_v19 = vsub.f32 -2.7725885, %v598_v18 }
 0xcfd   : > { %v600_v20 = vadd.f32 %v599_v19, %v578_v62 }
 0xcff   : > { %v601_v21 = vsel %vm199_vm0, %v600_v20, -inf }
 0xd00   : > { %602 = vmax.xlane.f32.xlu2 %v601_v21 }
 0xd73   : > { %v603_v22 = vpop.xlane.xlu2 %602 }
 0xd74   : > { %v604_v23 = vsub.f32 %v600_v20, %v603_v22 }
 0xd76   : > { %v605_v24 = vmul.f32 1.442695, %v604_v23 }
 0xd78   : > { %886 = vpow2.f32 %v605_v24 }
 0xd7e   : > { %v887_v26 = vpop.eup %886 }
 0xd7f   : > { %v607_v27 = vsel %vm199_vm0, %v887_v26, 0.0 }
 0xd80   : > { %608 = vadd.xlane.f32.xlu2 %v607_v27 }
 0xdf3   : > { %v609_v28 = vpop.xlane.xlu2 %608 }
 0xdf4   : > { %888 = vlog2.f32 %v609_v28 }
 0xdfa   : > { %v889_v29 = vpop.eup %888 }
 0xdfb   : > { %v611_v30 = vmul.f32 0.6931472, %v889_v29 }
 0xdfd   : > { %v612_v31 = vadd.f32 %v611_v30, %v603_v22 }
 0xdff   : > { %v613_v32 = vsub.f32 -2.0794415, %v612_v31 }
 0xe01   : > { %v614_v33 = vadd.f32 %v613_v32, %v600_v20 }
 0xe03   : > { %v615_v34 = vsel %vm199_vm0, %v614_v33, -inf }
 0xe04   : > { %v616_v35 = vrot.slane %v615_v34, 4 }
 0xe06   : > { %v617_v36 = vmax.f32 %v615_v34, %v616_v35 }
 0xe08   : > { %v618_v37 = vrot.slane %v617_v36, 2 }
 0xe0a   : > { %v619_v38 = vmax.f32 %v617_v36, %v618_v37 }
 0xe0c   : > { %v620_v39 = vrot.slane %v619_v38, 1 }
 0xe0e   : > { %v621_v40 = vmax.f32 %v619_v38, %v620_v39 }
 0xe10   : > { %v622_v41 = vsub.f32 %v614_v33, %v621_v40 }
 0xe12   : > { %v623_v42 = vmul.f32 1.442695, %v622_v41 }
 0xe14   : > { %890 = vpow2.f32 %v623_v42 }
 0xe1a   : > { %v891_v43 = vpop.eup %890 }
 0xe1b   : > { %v625_v44 = vsel %vm199_vm0, %v891_v43, 0.0 }
 0xe1c   : > { %v626_v45 = vrot.slane %v625_v44, 4 }
 0xe1e   : > { %v627_v46 = vadd.f32 %v626_v45, %v625_v44 }
 0xe20   : > { %v628_v47 = vrot.slane %v627_v46, 2 }
 0xe22   : > { %v629_v48 = vadd.f32 %v628_v47, %v627_v46 }
 0xe24   : > { %v630_v49 = vrot.slane %v629_v48, 1 }
 0xe26   : > { %v631_v50 = vadd.f32 %v630_v49, %v629_v48 }
 0xe28   : > { %892 = vlog2.f32 %v631_v50 }
 0xe2e   : > { %v893_v51 = vpop.eup %892 }
 0xe2f   : > { %v633_v52 = vmul.f32 0.6931472, %v893_v51 }
 0xe31   : > { %v634_v53 = vadd.f32 %v633_v52, %v621_v40 }
 0xe33   : > { %v635_v54 = vsub.f32 -2.7725885, %v634_v53 }
 0xe35   : > { %v636_v56 = vadd.f32 %v635_v54, %v614_v33 }
 0xe37   : > { %v637_v57 = vsel %vm199_vm0, %v636_v56, -inf }
 0xe38   : > { %638 = vmax.xlane.f32.xlu0 %v637_v57 }
 0xeab   : > { %v639_v58 = vpop.xlane.xlu0 %638 }
 0xeac   : > { %v640_v59 = vsub.f32 %v636_v56, %v639_v58 }
 0xeae   : > { %v641_v60 = vmul.f32 1.442695, %v640_v59 }
 0xeb0   : > { %894 = vpow2.f32 %v641_v60 }
 0xeb6   : > { %v895_v61 = vpop.eup %894 }
 0xeb7   : > { %v643_v62 = vsel %vm199_vm0, %v895_v61, 0.0 }
 0xeb8   : > { %644 = vadd.xlane.f32.xlu1 %v643_v62 }
 0xf2b   : > { %v645_v63 = vpop.xlane.xlu1 %644 }
 0xf2c   : > { %896 = vlog2.f32 %v645_v63 }
 0xf32   : > { %v897_v0 = vpop.eup %896 }
 0xf33   : > { %v647_v1 = vmul.f32 0.6931472, %v897_v0 }
 0xf35   : > { %v648_v2 = vadd.f32 %v647_v1, %v639_v58 }
 0xf37   : > { %v649_v3 = vsub.f32 -2.0794415, %v648_v2 }
 0xf39   : > { %v650_v56 = vadd.f32 %v649_v3, %v636_v56  }
 0xf3a PF: > { %s760_s26 = scalar_select %p1019_p5, 0, 1  ;;  %vm670_vm3 = vcmask 0   ;;  %v930_v56 = vphi %v1030_v56, %v650_v56  }
 0xf3c   : > { %v757_v4 = vstv %s760_s26 }
 0xf3d   : > { %vm758_vm2 = vcmp.ne.s32.totalorder %v757_v4, 0 }
 0xf3e   : > { %v759_v5 = vsel %vm758_vm2, %v1073_v55, %v930_v56 }
 0xf3f   : > { %v656_v6 = vmul.f32 1.442695, %v759_v5 }
 0xf41   : > { %898 = vpow2.f32 %v656_v6 }
 0xf47   : > { %v899_v7 = vpop.eup %898 }
 0xf48   : > { %v658_v8 = vmul.f32 %v899_v7, %v973_v25 }
 0xf4a   : > { %v660_v9 = vsel %vm199_vm0, %v658_v8, 0.0 }
 0xf4b   : > { %661 = vadd.xlane.f32.xlu0 %v660_v9 }
 0xfbe   : > { %v662_v10 = vpop.xlane.xlu0 %661 }
 0xfbf   : > { %v663_v11 = vrot.slane %v662_v10, 4 }
 0xfc1   : > { %v664_v12 = vadd.f32 %v663_v11, %v662_v10 }
 0xfc3   : > { %v665_v13 = vrot.slane %v664_v12, 2 }
 0xfc5   : > { %v666_v14 = vadd.f32 %v665_v13, %v664_v12 }
 0xfc7   : > { %v667_v15 = vrot.slane %v666_v14, 1 }
 0xfc9   : > { %v668_v16 = vadd.f32 %v667_v15, %v666_v14 }
 0xfcb   : > { %v669_v17 = vmul.f32 -0.1, %v668_v16 }
 0xfcd   : > { %671 = vst.msk [vmem:[%s153_s14] sm:$0x1] %vm670_vm3, %v669_v17 }
 0xfce PF: > { %s12_s9 = sadd.s32 1, %s918_s9  }
 0xfcf   : > { %p9_p7 = scmp.ge.s32.totalorder %s12_s9, 4  }
 0xfd1   :  { %11 = sbr.rel (!%p9_p7) target bundleno = 1 (0x1), region = 87 }

</bundles_post_ra>
